<compile_context>
chip_gen: v7x
topology: tpu7x:2x2x1
jax: 0.10.0
libtpu: 0.0.40
codegen_flags: <defaults>
</compile_context>

<pallas_src>
import jax
import jax.numpy as jnp
import numpy as np
from jax import lax
from jax.experimental import pallas as pl
from jax.experimental.pallas import tpu as pltpu

BN_EPS = 1e-5


def make_rrcnn_kernel(N, H, W, Cout):
    WC = W * Cout
    NH = N * H
    inv_nhw = 1.0 / float(N * H * W)

    def kernel(x_ref, w1_ref, b1_ref, w3_ref, g_ref, bt_ref,
               mtop_ref, mbot_ref, o_ref):
        # Hoisted loop invariants (JAX does not CSE broadcasts across the 4
        # conv invocations, so load the masks exactly once).
        mask_top = mtop_ref[...]          # zero at rows h == 0   (per image)
        mask_bot = mbot_ref[...]          # zero at rows h == H-1 (per image)

        def conv_bn_relu(v, j):
            # --- 3x3 conv as ONE fused K=3*WC matmul ------------------------
            # ky shifts: in-register sublane rotations (XLU) + halo masks.
            # kx shift + channel mix: block-banded weight (built in wrapper).
            a_up = pltpu.roll(v, 1, axis=0) * mask_top        # input row h-1
            a_dn = pltpu.roll(v, NH - 1, axis=0) * mask_bot   # input row h+1
            a = jnp.concatenate([a_up, v, a_dn], axis=1).astype(jnp.bfloat16)
            acc = jnp.dot(a, w3_ref[j], preferred_element_type=jnp.float32)

            # --- training-mode BatchNorm (single-pass stats) + ReLU ---------
            # One roll-tree over a (2, WC) block: sublane 0 = sum of x,
            # sublane 1 = sum of x^2 (halves the XLU rotate count).
            stats = jnp.concatenate(
                [jnp.sum(acc, axis=0, keepdims=True),
                 jnp.sum(acc * acc, axis=0, keepdims=True)], axis=0)
            sh = Cout
            while sh < WC:
                stats = stats + pltpu.roll(stats, sh, axis=1)
                sh *= 2
            m = stats[0:1, :] * inv_nhw
            var = stats[1:2, :] * inv_nhw - m * m              # biased variance
            scale = g_ref[j] * lax.rsqrt(var + BN_EPS)
            shift = bt_ref[j] - m * scale
            return jnp.maximum(acc * scale + shift, 0.0)

        # 1x1 conv (ch_in -> ch_out).  Its bias is not followed by BN: keep it.
        x0 = jnp.dot(x_ref[...], w1_ref[...],
                     preferred_element_type=jnp.float32) + b1_ref[...]

        # Recurrent_block #1 (t=2)
        x1 = conv_bn_relu(x0, 0)
        x1 = conv_bn_relu(x0 + x1, 1)
        # Recurrent_block #2 (t=2)
        x2 = conv_bn_relu(x1, 2)
        x2 = conv_bn_relu(x1 + x2, 3)

        o_ref[...] = x0 + x2

    return kernel


def _pack_params(params, W):
    """Precompute lane-packed biases/BN params and fused block-banded weights."""
    f32 = jnp.float32
    w1 = params["w1"].astype(f32)                  # (Cin, Cout)
    w3 = params["w3"].astype(f32)                  # (4, 3, 3, Cout, Cout) HWIO
    Cout = w1.shape[1]

    def shift_eye(k):
        return jnp.eye(W, W, k=k, dtype=f32)

    # 1x1 conv: block-diagonal (W*Cin, W*Cout)
    w1p = jnp.kron(jnp.eye(W, dtype=f32), w1)
    b1p = jnp.tile(params["b1"].astype(f32)[None, :], (1, W))            # (1, WC)
    # 3x3 convs: per-ky-tap block-banded (WC, WC) matrices (kx shift encoded in
    # the band -> implicit zero pad at W borders), fused along K into
    # (4, 3*WC, WC) so each conv is a single K=3*WC matmul.
    w3p = jnp.stack([
        jnp.concatenate([
            sum(jnp.kron(shift_eye(1 - dx), w3[j, dy, dx]) for dx in range(3))
            for dy in range(3)], axis=0)
        for j in range(4)])                                              # (4,3WC,WC)
    gp = jnp.tile(params["gamma"].astype(f32)[:, None, :], (1, 1, W))    # (4,1,WC)
    btp = jnp.tile(params["beta"].astype(f32)[:, None, :], (1, 1, W))    # (4,1,WC)
    # MXU operands in bf16 (single pass, f32 accumulation); BN params stay f32.
    return w1p.astype(jnp.bfloat16), b1p, w3p.astype(jnp.bfloat16), gp, btp


def rrcnn_block_forward(x_nchw, params):
    N, Cin, H, W = x_nchw.shape
    Cout = params["w1"].shape[1]
    WC = W * Cout
    NH = N * H
    assert W & (W - 1) == 0, "roll-tree channel reduction assumes power-of-two W"

    x = jnp.transpose(x_nchw, (0, 2, 3, 1)).astype(jnp.float32)   # NCHW -> NHWC
    x_packed = x.reshape(NH, W * Cin)                             # lane-packed
    # Pre-cast the MXU operand to bf16 and zero-pad the input lanes to a
    # multiple of 128 (lane-dense loads, halved input DMA, no in-kernel cast).
    in_pad = (-(W * Cin)) % 128
    x_packed = jnp.pad(x_packed, ((0, 0), (0, in_pad))).astype(jnp.bfloat16)

    w1p, b1p, w3p, gp, btp = _pack_params(params, W)
    w1p = jnp.pad(w1p, ((0, in_pad), (0, 0)))                     # zero rows

    # Precomputed per-image halo masks for the in-register ky shifts.
    h_idx = jnp.arange(NH, dtype=jnp.int32) % H
    mask_top = jnp.tile((h_idx != 0).astype(jnp.float32)[:, None], (1, WC))
    mask_bot = jnp.tile((h_idx != H - 1).astype(jnp.float32)[:, None], (1, WC))

    kernel = make_rrcnn_kernel(N, H, W, Cout)
    vmem = pl.BlockSpec(memory_space=pltpu.MemorySpace.VMEM)
    out_packed = pl.pallas_call(
        kernel,
        out_shape=jax.ShapeDtypeStruct((NH, WC), jnp.float32),
        in_specs=[vmem] * 8,
        out_specs=vmem,
    )(x_packed, w1p, b1p, w3p, gp, btp, mask_top, mask_bot)

    return jnp.transpose(out_packed.reshape(N, H, W, Cout), (0, 3, 1, 2))


def rrcnn_block_forward_ref(x_nchw, p):
    """Pure-JAX (XLA conv, f32/HIGHEST) reference with identical semantics."""
    x = jnp.transpose(x_nchw, (0, 2, 3, 1)).astype(jnp.float32)
    Cin = x.shape[-1]
    Cout = p["w1"].shape[1]
    dn = ("NHWC", "HWIO", "NHWC")
    hi = lax.Precision.HIGHEST

    def single(a, j):
        y = lax.conv_general_dilated(a, p["w3"][j], (1, 1), "SAME",
                                     dimension_numbers=dn, precision=hi) + p["b3"][j]
        m = jnp.mean(y, axis=(0, 1, 2), keepdims=True)
        v = jnp.mean((y - m) ** 2, axis=(0, 1, 2), keepdims=True)
        yh = (y - m) / jnp.sqrt(v + BN_EPS) * p["gamma"][j] + p["beta"][j]
        return jnp.maximum(yh, 0.0)

    x0 = lax.conv_general_dilated(x, p["w1"].reshape(1, 1, Cin, Cout), (1, 1),
                                  "SAME", dimension_numbers=dn, precision=hi) + p["b1"]
    x1 = single(x0, 0)
    x1 = single(x0 + x1, 1)
    x2 = single(x1, 2)
    x2 = single(x1 + x2, 3)
    return jnp.transpose(x0 + x2, (0, 3, 1, 2))


if __name__ == "__main__":
    key = jax.random.PRNGKey(0)
    N, Cin, H, W = 2, 4, 16, 16
    Cout, T = 8, 2                      # RRCNN_block(ch_in=4, ch_out=8, t=2)
    ks = jax.random.split(key, 8)

    params = {
        "w1":    0.30 * jax.random.normal(ks[0], (Cin, Cout), jnp.float32),
        "b1":    0.10 * jax.random.normal(ks[1], (Cout,), jnp.float32),
        "w3":    0.15 * jax.random.normal(ks[2], (2 * T, 3, 3, Cout, Cout), jnp.float32),
        "b3":    0.10 * jax.random.normal(ks[3], (2 * T, Cout), jnp.float32),  # cancelled by BN
        "gamma": 1.0 + 0.10 * jax.random.normal(ks[4], (2 * T, Cout), jnp.float32),
        "beta":  0.10 * jax.random.normal(ks[5], (2 * T, Cout), jnp.float32),
    }
    x = jax.random.normal(ks[6], (N, Cin, H, W), jnp.float32)   # NCHW, like PyTorch

    out = jax.block_until_ready(rrcnn_block_forward(x, params))
    ref = jax.block_until_ready(rrcnn_block_forward_ref(x, params))

    assert out.shape == (N, Cout, H, W), out.shape
    # Kernel uses single-pass bf16 MXU matmuls (f32 accumulation, f32 elsewhere);
    # compare against the f32/HIGHEST reference at bf16-pipeline tolerance.
    np.testing.assert_allclose(np.asarray(out), np.asarray(ref), rtol=3e-2, atol=3e-2)
    print("KERNEL_OK")
</pallas_src>

<mosaic_0001>
module attributes {stable_mosaic.version = 11 : i64} {
  func.func @kernel(%arg0: memref<32x128xbf16, #tpu.memory_space<vmem>>, %arg1: memref<128x128xbf16, #tpu.memory_space<vmem>>, %arg2: memref<1x128xf32, #tpu.memory_space<vmem>>, %arg3: memref<4x384x128xbf16, #tpu.memory_space<vmem>>, %arg4: memref<4x1x128xf32, #tpu.memory_space<vmem>>, %arg5: memref<4x1x128xf32, #tpu.memory_space<vmem>>, %arg6: memref<32x128xf32, #tpu.memory_space<vmem>>, %arg7: memref<32x128xf32, #tpu.memory_space<vmem>>, %arg8: memref<32x128xf32, #tpu.memory_space<vmem>>) attributes {dimension_semantics = [], scalar_prefetch = 0 : i64, scratch_operands = 0 : i64, tpu.core_type = #tpu.core_type<tc>} {
    %c0 = arith.constant 0 : index
    %c0_0 = arith.constant 0 : index
    %0 = vector.load %arg6[%c0, %c0_0] : memref<32x128xf32, #tpu.memory_space<vmem>>, vector<32x128xf32>
    %c0_1 = arith.constant 0 : index
    %c0_2 = arith.constant 0 : index
    %1 = vector.load %arg7[%c0_1, %c0_2] : memref<32x128xf32, #tpu.memory_space<vmem>>, vector<32x128xf32>
    %c0_3 = arith.constant 0 : index
    %c0_4 = arith.constant 0 : index
    %2 = vector.load %arg0[%c0_3, %c0_4] : memref<32x128xbf16, #tpu.memory_space<vmem>>, vector<32x128xbf16>
    %c0_5 = arith.constant 0 : index
    %c0_6 = arith.constant 0 : index
    %3 = vector.load %arg1[%c0_5, %c0_6] : memref<128x128xbf16, #tpu.memory_space<vmem>>, vector<128x128xbf16>
    %cst = arith.constant dense<0.000000e+00> : vector<32x128xf32>
    %4 = tpu.matmul %2, %3, %cst {dimension_numbers = #tpu.dot_dimension_numbers<[1], [0], [0], [1], [0, 0, 1, 1], [], []>} : vector<32x128xbf16>, vector<128x128xbf16>, vector<32x128xf32> -> vector<32x128xf32>
    %c0_7 = arith.constant 0 : index
    %c0_8 = arith.constant 0 : index
    %5 = vector.load %arg2[%c0_7, %c0_8] : memref<1x128xf32, #tpu.memory_space<vmem>>, vector<1x128xf32>
    %6 = vector.broadcast %5 : vector<1x128xf32> to vector<32x128xf32>
    %7 = arith.addf %4, %6 : vector<32x128xf32>
    %c1_i32 = arith.constant 1 : i32
    %8 = tpu.dynamic_rotate %7 by %c1_i32 dim 0 : vector<32x128xf32>, i32 -> vector<32x128xf32>
    %9 = arith.mulf %8, %0 : vector<32x128xf32>
    %c31_i32 = arith.constant 31 : i32
    %10 = tpu.dynamic_rotate %7 by %c31_i32 dim 0 : vector<32x128xf32>, i32 -> vector<32x128xf32>
    %11 = arith.mulf %10, %1 : vector<32x128xf32>
    %12 = tpu.concatenate %9, %7, %11 in 1 : vector<32x128xf32>, vector<32x128xf32>, vector<32x128xf32> -> vector<32x384xf32>
    %13 = arith.truncf %12 : vector<32x384xf32> to vector<32x384xbf16>
    %c0_9 = arith.constant 0 : index
    %c0_10 = arith.constant 0 : index
    %c0_11 = arith.constant 0 : index
    %14 = vector.load %arg3[%c0_9, %c0_10, %c0_11] : memref<4x384x128xbf16, #tpu.memory_space<vmem>>, vector<1x384x128xbf16>
    %15 = vector.shape_cast %14 : vector<1x384x128xbf16> to vector<384x128xbf16>
    %cst_12 = arith.constant dense<0.000000e+00> : vector<32x128xf32>
    %16 = tpu.matmul %13, %15, %cst_12 {dimension_numbers = #tpu.dot_dimension_numbers<[1], [0], [0], [1], [0, 0, 1, 1], [], []>} : vector<32x384xbf16>, vector<384x128xbf16>, vector<32x128xf32> -> vector<32x128xf32>
    %cst_13 = arith.constant dense<0.000000e+00> : vector<128xf32>
    %17 = vector.multi_reduction <add>, %16, %cst_13 [0] : vector<32x128xf32> to vector<128xf32>
    %18 = vector.shape_cast %17 : vector<128xf32> to vector<1x128xf32>
    %19 = arith.mulf %16, %16 : vector<32x128xf32>
    %cst_14 = arith.constant dense<0.000000e+00> : vector<128xf32>
    %20 = vector.multi_reduction <add>, %19, %cst_14 [0] : vector<32x128xf32> to vector<128xf32>
    %21 = vector.shape_cast %20 : vector<128xf32> to vector<1x128xf32>
    %22 = tpu.concatenate %18, %21 in 0 : vector<1x128xf32>, vector<1x128xf32> -> vector<2x128xf32>
    %c8_i32 = arith.constant 8 : i32
    %23 = tpu.dynamic_rotate %22 by %c8_i32 dim 1 : vector<2x128xf32>, i32 -> vector<2x128xf32>
    %24 = arith.addf %22, %23 : vector<2x128xf32>
    %c16_i32 = arith.constant 16 : i32
    %25 = tpu.dynamic_rotate %24 by %c16_i32 dim 1 : vector<2x128xf32>, i32 -> vector<2x128xf32>
    %26 = arith.addf %24, %25 : vector<2x128xf32>
    %c32_i32 = arith.constant 32 : i32
    %27 = tpu.dynamic_rotate %26 by %c32_i32 dim 1 : vector<2x128xf32>, i32 -> vector<2x128xf32>
    %28 = arith.addf %26, %27 : vector<2x128xf32>
    %c64_i32 = arith.constant 64 : i32
    %29 = tpu.dynamic_rotate %28 by %c64_i32 dim 1 : vector<2x128xf32>, i32 -> vector<2x128xf32>
    %30 = arith.addf %28, %29 : vector<2x128xf32>
    %31 = vector.extract_strided_slice %30 {offsets = [0, 0], sizes = [1, 128], strides = [1, 1]} : vector<2x128xf32> to vector<1x128xf32>
    %cst_15 = arith.constant 0.001953125 : f32
    %32 = vector.broadcast %cst_15 : f32 to vector<1x128xf32>
    %33 = arith.mulf %31, %32 : vector<1x128xf32>
    %34 = vector.extract_strided_slice %30 {offsets = [1, 0], sizes = [1, 128], strides = [1, 1]} : vector<2x128xf32> to vector<1x128xf32>
    %cst_16 = arith.constant 0.001953125 : f32
    %35 = vector.broadcast %cst_16 : f32 to vector<1x128xf32>
    %36 = arith.mulf %34, %35 : vector<1x128xf32>
    %37 = arith.mulf %33, %33 : vector<1x128xf32>
    %38 = arith.subf %36, %37 : vector<1x128xf32>
    %c0_17 = arith.constant 0 : index
    %c0_18 = arith.constant 0 : index
    %c0_19 = arith.constant 0 : index
    %39 = vector.load %arg4[%c0_17, %c0_18, %c0_19] : memref<4x1x128xf32, #tpu.memory_space<vmem>>, vector<1x1x128xf32>
    %40 = vector.shape_cast %39 : vector<1x1x128xf32> to vector<1x128xf32>
    %cst_20 = arith.constant 9.99999974E-6 : f32
    %41 = vector.broadcast %cst_20 : f32 to vector<1x128xf32>
    %42 = arith.addf %38, %41 : vector<1x128xf32>
    %43 = math.rsqrt %42 : vector<1x128xf32>
    %44 = arith.mulf %40, %43 : vector<1x128xf32>
    %c0_21 = arith.constant 0 : index
    %c0_22 = arith.constant 0 : index
    %c0_23 = arith.constant 0 : index
    %45 = vector.load %arg5[%c0_21, %c0_22, %c0_23] : memref<4x1x128xf32, #tpu.memory_space<vmem>>, vector<1x1x128xf32>
    %46 = vector.shape_cast %45 : vector<1x1x128xf32> to vector<1x128xf32>
    %47 = arith.mulf %33, %44 : vector<1x128xf32>
    %48 = arith.subf %46, %47 : vector<1x128xf32>
    %49 = vector.broadcast %44 : vector<1x128xf32> to vector<32x128xf32>
    %50 = arith.mulf %16, %49 : vector<32x128xf32>
    %51 = vector.broadcast %48 : vector<1x128xf32> to vector<32x128xf32>
    %52 = arith.addf %50, %51 : vector<32x128xf32>
    %cst_24 = arith.constant 0.000000e+00 : f32
    %53 = vector.broadcast %cst_24 : f32 to vector<32x128xf32>
    %54 = arith.maximumf %52, %53 : vector<32x128xf32>
    %55 = arith.addf %7, %54 : vector<32x128xf32>
    %c1_i32_25 = arith.constant 1 : i32
    %56 = tpu.dynamic_rotate %55 by %c1_i32_25 dim 0 : vector<32x128xf32>, i32 -> vector<32x128xf32>
    %57 = arith.mulf %56, %0 : vector<32x128xf32>
    %c31_i32_26 = arith.constant 31 : i32
    %58 = tpu.dynamic_rotate %55 by %c31_i32_26 dim 0 : vector<32x128xf32>, i32 -> vector<32x128xf32>
    %59 = arith.mulf %58, %1 : vector<32x128xf32>
    %60 = tpu.concatenate %57, %55, %59 in 1 : vector<32x128xf32>, vector<32x128xf32>, vector<32x128xf32> -> vector<32x384xf32>
    %61 = arith.truncf %60 : vector<32x384xf32> to vector<32x384xbf16>
    %c1 = arith.constant 1 : index
    %c0_27 = arith.constant 0 : index
    %c0_28 = arith.constant 0 : index
    %62 = vector.load %arg3[%c1, %c0_27, %c0_28] : memref<4x384x128xbf16, #tpu.memory_space<vmem>>, vector<1x384x128xbf16>
    %63 = vector.shape_cast %62 : vector<1x384x128xbf16> to vector<384x128xbf16>
    %cst_29 = arith.constant dense<0.000000e+00> : vector<32x128xf32>
    %64 = tpu.matmul %61, %63, %cst_29 {dimension_numbers = #tpu.dot_dimension_numbers<[1], [0], [0], [1], [0, 0, 1, 1], [], []>} : vector<32x384xbf16>, vector<384x128xbf16>, vector<32x128xf32> -> vector<32x128xf32>
    %cst_30 = arith.constant dense<0.000000e+00> : vector<128xf32>
    %65 = vector.multi_reduction <add>, %64, %cst_30 [0] : vector<32x128xf32> to vector<128xf32>
    %66 = vector.shape_cast %65 : vector<128xf32> to vector<1x128xf32>
    %67 = arith.mulf %64, %64 : vector<32x128xf32>
    %cst_31 = arith.constant dense<0.000000e+00> : vector<128xf32>
    %68 = vector.multi_reduction <add>, %67, %cst_31 [0] : vector<32x128xf32> to vector<128xf32>
    %69 = vector.shape_cast %68 : vector<128xf32> to vector<1x128xf32>
    %70 = tpu.concatenate %66, %69 in 0 : vector<1x128xf32>, vector<1x128xf32> -> vector<2x128xf32>
    %c8_i32_32 = arith.constant 8 : i32
    %71 = tpu.dynamic_rotate %70 by %c8_i32_32 dim 1 : vector<2x128xf32>, i32 -> vector<2x128xf32>
    %72 = arith.addf %70, %71 : vector<2x128xf32>
    %c16_i32_33 = arith.constant 16 : i32
    %73 = tpu.dynamic_rotate %72 by %c16_i32_33 dim 1 : vector<2x128xf32>, i32 -> vector<2x128xf32>
    %74 = arith.addf %72, %73 : vector<2x128xf32>
    %c32_i32_34 = arith.constant 32 : i32
    %75 = tpu.dynamic_rotate %74 by %c32_i32_34 dim 1 : vector<2x128xf32>, i32 -> vector<2x128xf32>
    %76 = arith.addf %74, %75 : vector<2x128xf32>
    %c64_i32_35 = arith.constant 64 : i32
    %77 = tpu.dynamic_rotate %76 by %c64_i32_35 dim 1 : vector<2x128xf32>, i32 -> vector<2x128xf32>
    %78 = arith.addf %76, %77 : vector<2x128xf32>
    %79 = vector.extract_strided_slice %78 {offsets = [0, 0], sizes = [1, 128], strides = [1, 1]} : vector<2x128xf32> to vector<1x128xf32>
    %cst_36 = arith.constant 0.001953125 : f32
    %80 = vector.broadcast %cst_36 : f32 to vector<1x128xf32>
    %81 = arith.mulf %79, %80 : vector<1x128xf32>
    %82 = vector.extract_strided_slice %78 {offsets = [1, 0], sizes = [1, 128], strides = [1, 1]} : vector<2x128xf32> to vector<1x128xf32>
    %cst_37 = arith.constant 0.001953125 : f32
    %83 = vector.broadcast %cst_37 : f32 to vector<1x128xf32>
    %84 = arith.mulf %82, %83 : vector<1x128xf32>
    %85 = arith.mulf %81, %81 : vector<1x128xf32>
    %86 = arith.subf %84, %85 : vector<1x128xf32>
    %c1_38 = arith.constant 1 : index
    %c0_39 = arith.constant 0 : index
    %c0_40 = arith.constant 0 : index
    %87 = vector.load %arg4[%c1_38, %c0_39, %c0_40] : memref<4x1x128xf32, #tpu.memory_space<vmem>>, vector<1x1x128xf32>
    %88 = vector.shape_cast %87 : vector<1x1x128xf32> to vector<1x128xf32>
    %cst_41 = arith.constant 9.99999974E-6 : f32
    %89 = vector.broadcast %cst_41 : f32 to vector<1x128xf32>
    %90 = arith.addf %86, %89 : vector<1x128xf32>
    %91 = math.rsqrt %90 : vector<1x128xf32>
    %92 = arith.mulf %88, %91 : vector<1x128xf32>
    %c1_42 = arith.constant 1 : index
    %c0_43 = arith.constant 0 : index
    %c0_44 = arith.constant 0 : index
    %93 = vector.load %arg5[%c1_42, %c0_43, %c0_44] : memref<4x1x128xf32, #tpu.memory_space<vmem>>, vector<1x1x128xf32>
    %94 = vector.shape_cast %93 : vector<1x1x128xf32> to vector<1x128xf32>
    %95 = arith.mulf %81, %92 : vector<1x128xf32>
    %96 = arith.subf %94, %95 : vector<1x128xf32>
    %97 = vector.broadcast %92 : vector<1x128xf32> to vector<32x128xf32>
    %98 = arith.mulf %64, %97 : vector<32x128xf32>
    %99 = vector.broadcast %96 : vector<1x128xf32> to vector<32x128xf32>
    %100 = arith.addf %98, %99 : vector<32x128xf32>
    %cst_45 = arith.constant 0.000000e+00 : f32
    %101 = vector.broadcast %cst_45 : f32 to vector<32x128xf32>
    %102 = arith.maximumf %100, %101 : vector<32x128xf32>
    %c1_i32_46 = arith.constant 1 : i32
    %103 = tpu.dynamic_rotate %102 by %c1_i32_46 dim 0 : vector<32x128xf32>, i32 -> vector<32x128xf32>
    %104 = arith.mulf %103, %0 : vector<32x128xf32>
    %c31_i32_47 = arith.constant 31 : i32
    %105 = tpu.dynamic_rotate %102 by %c31_i32_47 dim 0 : vector<32x128xf32>, i32 -> vector<32x128xf32>
    %106 = arith.mulf %105, %1 : vector<32x128xf32>
    %107 = tpu.concatenate %104, %102, %106 in 1 : vector<32x128xf32>, vector<32x128xf32>, vector<32x128xf32> -> vector<32x384xf32>
    %108 = arith.truncf %107 : vector<32x384xf32> to vector<32x384xbf16>
    %c2 = arith.constant 2 : index
    %c0_48 = arith.constant 0 : index
    %c0_49 = arith.constant 0 : index
    %109 = vector.load %arg3[%c2, %c0_48, %c0_49] : memref<4x384x128xbf16, #tpu.memory_space<vmem>>, vector<1x384x128xbf16>
    %110 = vector.shape_cast %109 : vector<1x384x128xbf16> to vector<384x128xbf16>
    %cst_50 = arith.constant dense<0.000000e+00> : vector<32x128xf32>
    %111 = tpu.matmul %108, %110, %cst_50 {dimension_numbers = #tpu.dot_dimension_numbers<[1], [0], [0], [1], [0, 0, 1, 1], [], []>} : vector<32x384xbf16>, vector<384x128xbf16>, vector<32x128xf32> -> vector<32x128xf32>
    %cst_51 = arith.constant dense<0.000000e+00> : vector<128xf32>
    %112 = vector.multi_reduction <add>, %111, %cst_51 [0] : vector<32x128xf32> to vector<128xf32>
    %113 = vector.shape_cast %112 : vector<128xf32> to vector<1x128xf32>
    %114 = arith.mulf %111, %111 : vector<32x128xf32>
    %cst_52 = arith.constant dense<0.000000e+00> : vector<128xf32>
    %115 = vector.multi_reduction <add>, %114, %cst_52 [0] : vector<32x128xf32> to vector<128xf32>
    %116 = vector.shape_cast %115 : vector<128xf32> to vector<1x128xf32>
    %117 = tpu.concatenate %113, %116 in 0 : vector<1x128xf32>, vector<1x128xf32> -> vector<2x128xf32>
    %c8_i32_53 = arith.constant 8 : i32
    %118 = tpu.dynamic_rotate %117 by %c8_i32_53 dim 1 : vector<2x128xf32>, i32 -> vector<2x128xf32>
    %119 = arith.addf %117, %118 : vector<2x128xf32>
    %c16_i32_54 = arith.constant 16 : i32
    %120 = tpu.dynamic_rotate %119 by %c16_i32_54 dim 1 : vector<2x128xf32>, i32 -> vector<2x128xf32>
    %121 = arith.addf %119, %120 : vector<2x128xf32>
    %c32_i32_55 = arith.constant 32 : i32
    %122 = tpu.dynamic_rotate %121 by %c32_i32_55 dim 1 : vector<2x128xf32>, i32 -> vector<2x128xf32>
    %123 = arith.addf %121, %122 : vector<2x128xf32>
    %c64_i32_56 = arith.constant 64 : i32
    %124 = tpu.dynamic_rotate %123 by %c64_i32_56 dim 1 : vector<2x128xf32>, i32 -> vector<2x128xf32>
    %125 = arith.addf %123, %124 : vector<2x128xf32>
    %126 = vector.extract_strided_slice %125 {offsets = [0, 0], sizes = [1, 128], strides = [1, 1]} : vector<2x128xf32> to vector<1x128xf32>
    %cst_57 = arith.constant 0.001953125 : f32
    %127 = vector.broadcast %cst_57 : f32 to vector<1x128xf32>
    %128 = arith.mulf %126, %127 : vector<1x128xf32>
    %129 = vector.extract_strided_slice %125 {offsets = [1, 0], sizes = [1, 128], strides = [1, 1]} : vector<2x128xf32> to vector<1x128xf32>
    %cst_58 = arith.constant 0.001953125 : f32
    %130 = vector.broadcast %cst_58 : f32 to vector<1x128xf32>
    %131 = arith.mulf %129, %130 : vector<1x128xf32>
    %132 = arith.mulf %128, %128 : vector<1x128xf32>
    %133 = arith.subf %131, %132 : vector<1x128xf32>
    %c2_59 = arith.constant 2 : index
    %c0_60 = arith.constant 0 : index
    %c0_61 = arith.constant 0 : index
    %134 = vector.load %arg4[%c2_59, %c0_60, %c0_61] : memref<4x1x128xf32, #tpu.memory_space<vmem>>, vector<1x1x128xf32>
    %135 = vector.shape_cast %134 : vector<1x1x128xf32> to vector<1x128xf32>
    %cst_62 = arith.constant 9.99999974E-6 : f32
    %136 = vector.broadcast %cst_62 : f32 to vector<1x128xf32>
    %137 = arith.addf %133, %136 : vector<1x128xf32>
    %138 = math.rsqrt %137 : vector<1x128xf32>
    %139 = arith.mulf %135, %138 : vector<1x128xf32>
    %c2_63 = arith.constant 2 : index
    %c0_64 = arith.constant 0 : index
    %c0_65 = arith.constant 0 : index
    %140 = vector.load %arg5[%c2_63, %c0_64, %c0_65] : memref<4x1x128xf32, #tpu.memory_space<vmem>>, vector<1x1x128xf32>
    %141 = vector.shape_cast %140 : vector<1x1x128xf32> to vector<1x128xf32>
    %142 = arith.mulf %128, %139 : vector<1x128xf32>
    %143 = arith.subf %141, %142 : vector<1x128xf32>
    %144 = vector.broadcast %139 : vector<1x128xf32> to vector<32x128xf32>
    %145 = arith.mulf %111, %144 : vector<32x128xf32>
    %146 = vector.broadcast %143 : vector<1x128xf32> to vector<32x128xf32>
    %147 = arith.addf %145, %146 : vector<32x128xf32>
    %cst_66 = arith.constant 0.000000e+00 : f32
    %148 = vector.broadcast %cst_66 : f32 to vector<32x128xf32>
    %149 = arith.maximumf %147, %148 : vector<32x128xf32>
    %150 = arith.addf %102, %149 : vector<32x128xf32>
    %c1_i32_67 = arith.constant 1 : i32
    %151 = tpu.dynamic_rotate %150 by %c1_i32_67 dim 0 : vector<32x128xf32>, i32 -> vector<32x128xf32>
    %152 = arith.mulf %151, %0 : vector<32x128xf32>
    %c31_i32_68 = arith.constant 31 : i32
    %153 = tpu.dynamic_rotate %150 by %c31_i32_68 dim 0 : vector<32x128xf32>, i32 -> vector<32x128xf32>
    %154 = arith.mulf %153, %1 : vector<32x128xf32>
    %155 = tpu.concatenate %152, %150, %154 in 1 : vector<32x128xf32>, vector<32x128xf32>, vector<32x128xf32> -> vector<32x384xf32>
    %156 = arith.truncf %155 : vector<32x384xf32> to vector<32x384xbf16>
    %c3 = arith.constant 3 : index
    %c0_69 = arith.constant 0 : index
    %c0_70 = arith.constant 0 : index
    %157 = vector.load %arg3[%c3, %c0_69, %c0_70] : memref<4x384x128xbf16, #tpu.memory_space<vmem>>, vector<1x384x128xbf16>
    %158 = vector.shape_cast %157 : vector<1x384x128xbf16> to vector<384x128xbf16>
    %cst_71 = arith.constant dense<0.000000e+00> : vector<32x128xf32>
    %159 = tpu.matmul %156, %158, %cst_71 {dimension_numbers = #tpu.dot_dimension_numbers<[1], [0], [0], [1], [0, 0, 1, 1], [], []>} : vector<32x384xbf16>, vector<384x128xbf16>, vector<32x128xf32> -> vector<32x128xf32>
    %cst_72 = arith.constant dense<0.000000e+00> : vector<128xf32>
    %160 = vector.multi_reduction <add>, %159, %cst_72 [0] : vector<32x128xf32> to vector<128xf32>
    %161 = vector.shape_cast %160 : vector<128xf32> to vector<1x128xf32>
    %162 = arith.mulf %159, %159 : vector<32x128xf32>
    %cst_73 = arith.constant dense<0.000000e+00> : vector<128xf32>
    %163 = vector.multi_reduction <add>, %162, %cst_73 [0] : vector<32x128xf32> to vector<128xf32>
    %164 = vector.shape_cast %163 : vector<128xf32> to vector<1x128xf32>
    %165 = tpu.concatenate %161, %164 in 0 : vector<1x128xf32>, vector<1x128xf32> -> vector<2x128xf32>
    %c8_i32_74 = arith.constant 8 : i32
    %166 = tpu.dynamic_rotate %165 by %c8_i32_74 dim 1 : vector<2x128xf32>, i32 -> vector<2x128xf32>
    %167 = arith.addf %165, %166 : vector<2x128xf32>
    %c16_i32_75 = arith.constant 16 : i32
    %168 = tpu.dynamic_rotate %167 by %c16_i32_75 dim 1 : vector<2x128xf32>, i32 -> vector<2x128xf32>
    %169 = arith.addf %167, %168 : vector<2x128xf32>
    %c32_i32_76 = arith.constant 32 : i32
    %170 = tpu.dynamic_rotate %169 by %c32_i32_76 dim 1 : vector<2x128xf32>, i32 -> vector<2x128xf32>
    %171 = arith.addf %169, %170 : vector<2x128xf32>
    %c64_i32_77 = arith.constant 64 : i32
    %172 = tpu.dynamic_rotate %171 by %c64_i32_77 dim 1 : vector<2x128xf32>, i32 -> vector<2x128xf32>
    %173 = arith.addf %171, %172 : vector<2x128xf32>
    %174 = vector.extract_strided_slice %173 {offsets = [0, 0], sizes = [1, 128], strides = [1, 1]} : vector<2x128xf32> to vector<1x128xf32>
    %cst_78 = arith.constant 0.001953125 : f32
    %175 = vector.broadcast %cst_78 : f32 to vector<1x128xf32>
    %176 = arith.mulf %174, %175 : vector<1x128xf32>
    %177 = vector.extract_strided_slice %173 {offsets = [1, 0], sizes = [1, 128], strides = [1, 1]} : vector<2x128xf32> to vector<1x128xf32>
    %cst_79 = arith.constant 0.001953125 : f32
    %178 = vector.broadcast %cst_79 : f32 to vector<1x128xf32>
    %179 = arith.mulf %177, %178 : vector<1x128xf32>
    %180 = arith.mulf %176, %176 : vector<1x128xf32>
    %181 = arith.subf %179, %180 : vector<1x128xf32>
    %c3_80 = arith.constant 3 : index
    %c0_81 = arith.constant 0 : index
    %c0_82 = arith.constant 0 : index
    %182 = vector.load %arg4[%c3_80, %c0_81, %c0_82] : memref<4x1x128xf32, #tpu.memory_space<vmem>>, vector<1x1x128xf32>
    %183 = vector.shape_cast %182 : vector<1x1x128xf32> to vector<1x128xf32>
    %cst_83 = arith.constant 9.99999974E-6 : f32
    %184 = vector.broadcast %cst_83 : f32 to vector<1x128xf32>
    %185 = arith.addf %181, %184 : vector<1x128xf32>
    %186 = math.rsqrt %185 : vector<1x128xf32>
    %187 = arith.mulf %183, %186 : vector<1x128xf32>
    %c3_84 = arith.constant 3 : index
    %c0_85 = arith.constant 0 : index
    %c0_86 = arith.constant 0 : index
    %188 = vector.load %arg5[%c3_84, %c0_85, %c0_86] : memref<4x1x128xf32, #tpu.memory_space<vmem>>, vector<1x1x128xf32>
    %189 = vector.shape_cast %188 : vector<1x1x128xf32> to vector<1x128xf32>
    %190 = arith.mulf %176, %187 : vector<1x128xf32>
    %191 = arith.subf %189, %190 : vector<1x128xf32>
    %192 = vector.broadcast %187 : vector<1x128xf32> to vector<32x128xf32>
    %193 = arith.mulf %159, %192 : vector<32x128xf32>
    %194 = vector.broadcast %191 : vector<1x128xf32> to vector<32x128xf32>
    %195 = arith.addf %193, %194 : vector<32x128xf32>
    %cst_87 = arith.constant 0.000000e+00 : f32
    %196 = vector.broadcast %cst_87 : f32 to vector<32x128xf32>
    %197 = arith.maximumf %195, %196 : vector<32x128xf32>
    %198 = arith.addf %7, %197 : vector<32x128xf32>
    %c0_88 = arith.constant 0 : index
    %c0_89 = arith.constant 0 : index
    %199 = vector.load %arg8[%c0_88, %c0_89] : memref<32x128xf32, #tpu.memory_space<vmem>>, vector<32x128xf32>
    tpu.vector_store %arg8[%c0_88, %c0_89], %198 {strides = array<i32>} : memref<32x128xf32, #tpu.memory_space<vmem>>, vector<32x128xf32>,
    return
  }
}

</mosaic_0001>

<bundles_post_ra>
// kernel: tpu_custom_call.1
= control target key start
LH: loop header
LB: loop body
LE: loop exit
PB: predicated region body
PF: predicated region fallthrough
CT: control target
= control target key end

     0   :  { %13 = vsyncpa [#allocation3], 0  ;;  %s3047_s0 = inlined_call_operand.hbm [shape: bf16[32,128], index: 0, kind: input, shape index: {}]   ;;  %s3048_s1 = inlined_call_operand.hbm [shape: bf16[128,128], index: 1, kind: input, shape index: {}]   ;;  %s3049_s2 = inlined_call_operand.vmem [shape: f32[1,128], index: 2, kind: input, shape index: {}]   ;;  %s3050_s3 = inlined_call_operand.hbm [shape: bf16[4,384,128], index: 3, kind: input, shape index: {}]   ;;  %s3051_s4 = inlined_call_operand.vmem [shape: f32[4,1,128], index: 4, kind: input, shape index: {}]   ;;  %s3052_s5 = inlined_call_operand.vmem [shape: f32[4,1,128], index: 5, kind: input, shape index: {}]   ;;  %s3053_s6 = inlined_call_operand.hbm [shape: f32[32,128], index: 6, kind: input, shape index: {}]   ;;  %s3054_s7 = inlined_call_operand.hbm [shape: f32[32,128], index: 7, kind: input, shape index: {}]   ;;  %s3055_s8 = inlined_call_operand.hbm [shape: f32[32,128], index: 8, kind: output, shape index: {}]  }
   0x1   :  { %14 = vsyncpa [#allocation6], 0 }
   0x2   :  { %15 = vsyncpa [#allocation9], 0 }
   0x3   :  { %16 = vsyncpa [#allocation4], 0  ;;  %s2578_s27 = smov [#allocation5]   ;;  %s2579_s29 = smov [#allocation8]  }
   0x4   :  { %s34_s28 = sshll.u32 %s2578_s27, 4  ;;  %s64_s30 = sshll.u32 %s2579_s29, 4  ;;  %s35_s28 = int_to_ptr.vmem [resolvable:$true] %s34_s28  ;;  %s2636_s30 = int_to_ptr.vmem [resolvable:$true] %s64_s30 }
   0x5   :  { %s2438_s11 = scalar_lea.hbm %s3048_s1, 1024 }
   0x6   :  { %p2439_p0 = scmp.ne.s32.totalorder %s3048_s1, %s2438_s11  ;;  %p2442_p1 = scmp.lt.u32.totalorder %s2438_s11, %s3048_s1 }
   0x8   :  { %p2444_p2 = pnand %p2442_p1, %p2439_p0 }
   0xa   :  { %2447 = shalt.err (!%p2444_p2)
}
   0xb   :  { %s2448_s16 = scalar_lea.vmem %s35_s28, 1024  ;;  %p2453_p4 = scmp.lt.s32.totalorder %s35_s28, %s35_s28 }
   0xc   :  { %p2449_p3 = scmp.ne.s32.totalorder %s35_s28, %s2448_s16  ;;  %p2454_p5 = scmp.lt.s32.totalorder %s2448_s16, %s2448_s16 }
   0xe   :  { %p2455_p6 = por %p2454_p5, %p2453_p4 }
  0x10   :  { %p2456_p7 = pnand %p2455_p6, %p2449_p3 }
  0x12   :  { %2459 = shalt.err (!%p2456_p7)
}
  0x13   :  { %s2580_s17 = smov 64   ;;  %s2581_s18 = smov 4  }
  0x14   :  { %40 = dma.hbm_to_vmem [thread:$0]  %s3048_s1, 1024, %s35_s28, [#allocation6], %s2580_s17, %s2580_s17, %s2581_s18  }
  0x15   :  { %s2460_s23 = scalar_lea.hbm %s3053_s6, 512 }
  0x16   :  { %p2461_p8 = scmp.ne.s32.totalorder %s3053_s6, %s2460_s23  ;;  %p2464_p9 = scmp.lt.u32.totalorder %s2460_s23, %s3053_s6 }
  0x18   :  { %p2466_p10 = pnand %p2464_p9, %p2461_p8 }
  0x1a   :  { %2469 = shalt.err (!%p2466_p10)
}
  0x1b   :  { %s2470_s29 = scalar_lea.vmem %s2636_s30, 512  ;;  %p2475_p12 = scmp.lt.s32.totalorder %s2636_s30, %s2636_s30 }
  0x1c   :  { %p2471_p11 = scmp.ne.s32.totalorder %s2636_s30, %s2470_s29  ;;  %p2476_p13 = scmp.lt.s32.totalorder %s2470_s29, %s2470_s29 }
  0x1e   :  { %p2477_p0 = por %p2476_p13, %p2475_p12 }
  0x20   :  { %p2478_p1 = pnand %p2477_p0, %p2471_p11 }
  0x22   :  { %2481 = shalt.err (!%p2478_p1)
}
  0x23   :  { %s2582_s1 = smov 128   ;;  %s2583_s28 = smov 8  }
  0x24   :  { %70 = dma.hbm_to_vmem [thread:$0]  %s3053_s6, 512, %s2636_s30, [#allocation9], %s2582_s1, %s2582_s1, %s2583_s28  }
  0x25   :  { %s2584_s11 = smov [#allocation2]   ;;  %s2585_s13 = smov [#allocation7]  }
  0x26   :  { %s22_s12 = sshll.u32 %s2584_s11, 4  ;;  %s48_s14 = sshll.u32 %s2585_s13, 4  ;;  %s23_s12 = int_to_ptr.vmem [resolvable:$true] %s22_s12  ;;  %s2673_s14 = int_to_ptr.vmem [resolvable:$true] %s48_s14 }
  0x27   :  { %s2482_s19 = scalar_lea.hbm %s3047_s0, 256 }
  0x28   :  { %p2483_p2 = scmp.ne.s32.totalorder %s3047_s0, %s2482_s19  ;;  %p2486_p3 = scmp.lt.u32.totalorder %s2482_s19, %s3047_s0 }
  0x2a   :  { %p2488_p4 = pnand %p2486_p3, %p2483_p2 }
  0x2c   :  { %2491 = shalt.err (!%p2488_p4)
}
  0x2d   :  { %s2492_s6 = scalar_lea.vmem %s23_s12, 256  ;;  %p2497_p6 = scmp.lt.s32.totalorder %s23_s12, %s23_s12 }
  0x2e   :  { %p2493_p5 = scmp.ne.s32.totalorder %s23_s12, %s2492_s6  ;;  %p2498_p7 = scmp.lt.s32.totalorder %s2492_s6, %s2492_s6 }
  0x30   :  { %p2499_p8 = por %p2498_p7, %p2497_p6 }
  0x32   :  { %p2500_p9 = pnand %p2499_p8, %p2493_p5 }
  0x34   :  { %2503 = shalt.err (!%p2500_p9)
}
  0x35   :  { %28 = dma.hbm_to_vmem [thread:$0]  %s3047_s0, 256, %s23_s12, [#allocation3], %s2580_s17, %s2580_s17, %s2581_s18  }
  0x36   :  { %s2504_s27 = scalar_lea.hbm %s3050_s3, 12288 }
  0x37   :  { %p2505_p10 = scmp.ne.s32.totalorder %s3050_s3, %s2504_s27  ;;  %p2508_p11 = scmp.lt.u32.totalorder %s2504_s27, %s3050_s3 }
  0x39   :  { %p2510_p12 = pnand %p2508_p11, %p2505_p10 }
  0x3b   :  { %2513 = shalt.err (!%p2510_p12)
}
  0x3c   :  { %s2514_s13 = scalar_lea.vmem %s2673_s14, 12288  ;;  %p2519_p0 = scmp.lt.s32.totalorder %s2673_s14, %s2673_s14 }
  0x3d   :  { %p2515_p13 = scmp.ne.s32.totalorder %s2673_s14, %s2514_s13  ;;  %p2520_p1 = scmp.lt.s32.totalorder %s2514_s13, %s2514_s13 }
  0x3f   :  { %p2521_p2 = por %p2520_p1, %p2519_p0 }
  0x41   :  { %p2522_p3 = pnand %p2521_p2, %p2515_p13 }
  0x43   :  { %2525 = shalt.err (!%p2522_p3)
}
  0x44   :  { %54 = dma.hbm_to_vmem [thread:$0]  %s3050_s3, 12288, %s2673_s14, [#allocation6], %s2580_s17, %s2580_s17, %s2581_s18  }
  0x45   :  { %s2586_s15 = smov [#allocation10]   ;;  %s2526_s21 = scalar_lea.hbm %s3054_s7, 512 }
  0x46   :  { %s76_s16 = sshll.u32 %s2586_s15, 4  ;;  %p2527_p4 = scmp.ne.s32.totalorder %s3054_s7, %s2526_s21  ;;  %s77_s16 = int_to_ptr.vmem [resolvable:$true] %s76_s16 }
  0x47   :  { %p2530_p5 = scmp.lt.u32.totalorder %s2526_s21, %s3054_s7 }
  0x49   :  { %p2532_p6 = pnand %p2530_p5, %p2527_p4 }
  0x4b   :  { %2535 = shalt.err (!%p2532_p6)
}
  0x4c   :  { %s2536_s24 = scalar_lea.vmem %s77_s16, 512  ;;  %p2541_p8 = scmp.lt.s32.totalorder %s77_s16, %s77_s16 }
  0x4d   :  { %p2537_p7 = scmp.ne.s32.totalorder %s77_s16, %s2536_s24  ;;  %p2542_p9 = scmp.lt.s32.totalorder %s2536_s24, %s2536_s24 }
  0x4f   :  { %p2543_p10 = por %p2542_p9, %p2541_p8 }
  0x51   :  { %p2544_p11 = pnand %p2543_p10, %p2537_p7 }
  0x53   :  { %2547 = shalt.err (!%p2544_p11)
}
  0x54   :  { %82 = dma.hbm_to_vmem [thread:$0]  %s3054_s7, 512, %s77_s16, [#allocation9], %s2582_s1, %s2582_s1, %s2583_s28  }
  0x55   :  { %2570 = dma.done.wait [#allocation3], 256  }
  0x56   :  { %2571 = vsyncadd [#allocation3], 4294967040 }
  0x57   :  { %2572 = dma.done.wait [#allocation6], 13312  }
  0x58   :  { %2573 = vsyncadd [#allocation6], 4294953984 }
  0x59   :  { %2574 = dma.done.wait [#allocation9], 1024  }
  0x5a   :  { %2575 = vsyncadd [#allocation9], 4294966272  ;;  %v2316_v0 = vld [vmem:[#allocation5] sm:$0xff]   ;;  %v2317_v1 = vld [vmem:[#allocation5 + $0x8] sm:$0xff]   ;;  %v247_v34 = vlaneseq  ;;  %vm589_vm2 = vcmask 1040384   ;;  %s2588_s25 = smov 32  }
  0x5b   :  { %2203 = vmatprep.subr.bf16.mxu0 %v2316_v0  ;;  %v2318_v2 = vld [vmem:[#allocation5 + $0x10] sm:$0xff]   ;;  %v2319_v3 = vld [vmem:[#allocation5 + $0x18] sm:$0xff]   ;;  %v2326_v5 = vld [vmem:[#allocation7 + $0x40] sm:$0xff]  }
  0x5c   :  { %2204 = vmatpush3.bf16.msra.mxu0 %v2316_v0  ;;  %v2324_v4 = vld [vmem:[#allocation2] sm:$0xff]   ;;  %v2327_v6 = vld [vmem:[#allocation7] sm:$0xff]   ;;  %2051 = vmatprep.subr.bf16.mxu1 %v2326_v5  ;;  %v2329_v8 = vld [vmem:[#allocation7 + $0x48] sm:$0xff]   ;;  %v2728_v36 = vshrl.u32 %v247_v34, 7 }
  0x5d   :  { %2205 = vmatprep.subr.bf16.mxu0 %v2317_v1  ;;  %2219 = vmatprep.mubr.bf16.mxu0 %v2324_v4  ;;  %v2320_v7 = vld [vmem:[#allocation5 + $0x20] sm:$0xff]   ;;  %v2330_v9 = vld [vmem:[#allocation7 + $0x8] sm:$0xff]   ;;  %v2332_v11 = vld [vmem:[#allocation7 + $0x50] sm:$0xff]  }
  0x5e   :  { %2052 = vmatpush3.bf16.msra.mxu1 %v2327_v6  ;;  %v2321_v10 = vld [vmem:[#allocation5 + $0x28] sm:$0xff]   ;;  %v2333_v12 = vld [vmem:[#allocation7 + $0x10] sm:$0xff]   ;;  %v2335_v13 = vld [vmem:[#allocation7 + $0x58] sm:$0xff]   ;;  %vm249_vm0 = vcmp.lt.s32.totalorder %v2728_v36, 1  ;;  %vm262_vm1 = vcmp.lt.s32.totalorder %v2728_v36, 7 }
  0x5f   :  { %2053 = vmatprep.subr.bf16.mxu1 %v2329_v8  ;;  %v2322_v14 = vld [vmem:[#allocation5 + $0x30] sm:$0xff]   ;;  %v2336_v15 = vld [vmem:[#allocation7 + $0x18] sm:$0xff]   ;;  %v2338_v16 = vld [vmem:[#allocation7 + $0x60] sm:$0xff]  }
  0x60   :  { %2206 = vmatpush3.bf16.msra.mxu0 %v2317_v1  ;;  %v2323_v17 = vld [vmem:[#allocation5 + $0x38] sm:$0xff]   ;;  %v2339_v18 = vld [vmem:[#allocation7 + $0x20] sm:$0xff]   ;;  %v2331_v21 = vld [vmem:[#allocation7 + $0x88] sm:$0xff]  }
  0x61   :  { %2207 = vmatprep.subr.bf16.mxu0 %v2318_v2  ;;  %v2328_v19 = vld [vmem:[#allocation7 + $0x80] sm:$0xff]   ;;  %v2325_v20 = vld [vmem:[#allocation2 + $0x8] sm:$0xff]   ;;  %v2334_v22 = vld [vmem:[#allocation7 + $0x90] sm:$0xff]  }
  0x62   :  { %2054 = vmatpush3.bf16.msra.mxu1 %v2330_v9  ;;  %v2337_v23 = vld [vmem:[#allocation7 + $0x98] sm:$0xff]   ;;  %v2340_v24 = vld [vmem:[#allocation7 + $0xa0] sm:$0xff]   ;;  %v2341_v25 = vld [vmem:[#allocation7 + $0x68] sm:$0xff]  }
  0x63   :  { %2055 = vmatprep.subr.bf16.mxu1 %v2332_v11  ;;  %v2342_v26 = vld [vmem:[#allocation7 + $0x28] sm:$0xff]   ;;  %v2344_v28 = vld [vmem:[#allocation7 + $0x70] sm:$0xff]   ;;  %v2347_v31 = vld [vmem:[#allocation7 + $0x78] sm:$0xff]  }
  0x64   :  { %2208 = vmatpush3.bf16.msra.mxu0 %v2318_v2  ;;  %v2343_v27 = vld [vmem:[#allocation7 + $0xa8] sm:$0xff]   ;;  %v2345_v29 = vld [vmem:[#allocation7 + $0x30] sm:$0xff]   ;;  %v2348_v32 = vld [vmem:[#allocation7 + $0x38] sm:$0xff]  }
  0x65   :  { %2209 = vmatprep.subr.bf16.mxu0 %v2319_v3  ;;  %v2346_v30 = vld [vmem:[#allocation7 + $0xb0] sm:$0xff]   ;;  %v2349_v33 = vld [vmem:[#allocation7 + $0xb8] sm:$0xff]   ;;  %v2743_v48 = vld [vmem:[#allocation8] sm:$0xff] }
  0x66   :  { %2056 = vmatpush3.bf16.msra.mxu1 %v2333_v12  ;;  %v1928_v35 = vld [vmem:[%s3049_s2] ss:$0 sm:$0xff]  ;;  %v2751_v53 = vld [vmem:[#allocation8 + $0x8] sm:$0xff]  ;;  %v2754_v55 = vld [vmem:[#allocation10] sm:$0xff]  ;;  %s2587_s2 = smov 16  }
  0x67   :  { %2057 = vmatprep.subr.bf16.mxu1 %v2335_v13  ;;  %v2747_v51 = vld [vmem:[#allocation10 + $0x10] sm:$0xff]  ;;  %v2756_v56 = vld [vmem:[#allocation10 + $0x8] sm:$0xff]  ;;  %v2761_v59 = vld [vmem:[#allocation10 + $0x18] sm:$0xff] }
  0x68   :  { %2210 = vmatpush3.bf16.msra.mxu0 %v2319_v3  ;;  %v2782_v12 = vld [vmem:[#allocation8 + $0x10] sm:$0xff]  ;;  %v2784_v13 = vld [vmem:[#allocation8 + $0x18] sm:$0xff] }
  0x69   :  { %2211 = vmatprep.subr.bf16.mxu0 %v2320_v7 }
  0x6a   :  { %2058 = vmatpush3.bf16.msra.mxu1 %v2336_v15 }
  0x6b   :  { %2059 = vmatprep.subr.bf16.mxu1 %v2338_v16 }
  0x6c   :  { %2212 = vmatpush3.bf16.msra.mxu0 %v2320_v7 }
  0x6d   :  { %2213 = vmatprep.subr.bf16.mxu0 %v2321_v10 }
  0x6e   :  { %2060 = vmatpush3.bf16.msra.mxu1 %v2339_v18 }
  0x6f   :  { %2061 = vmatprep.subr.bf16.mxu1 %v2341_v25 }
  0x70   :  { %2214 = vmatpush3.bf16.msra.mxu0 %v2321_v10 }
  0x71   :  { %2215 = vmatprep.subr.bf16.mxu0 %v2322_v14 }
  0x72   :  { %2062 = vmatpush3.bf16.msra.mxu1 %v2342_v26 }
  0x73   :  { %2063 = vmatprep.subr.bf16.mxu1 %v2344_v28 }
  0x74   :  { %2216 = vmatpush3.bf16.msra.mxu0 %v2322_v14 }
  0x75   :  { %2217 = vmatprep.subr.bf16.mxu0 %v2323_v17 }
  0x76   :  { %2064 = vmatpush3.bf16.msra.mxu1 %v2345_v29 }
  0x77   :  { %2065 = vmatprep.subr.bf16.mxu1 %v2347_v31 }
  0x78   :  { %2218 = vmatpush3.bf16.msra.mxu0 %v2323_v17 }
  0x79   :  { %2223 = vmatprep.subr.bf16.mxu0 %v2328_v19 }
  0x7a   :  { %2066 = vmatpush3.bf16.msra.mxu1 %v2348_v32 }
  0x7b   :  { %2220 = vmatmul.mubr.bf16.vlgmr.msra.gmra.mrb[0].mxu0 %v2325_v20 }
  0x7c   :  { %2224 = vmatpush3.bf16.msra.mxu0 %v2328_v19 }
  0x7d   :  { %2225 = vmatprep.subr.bf16.mxu0 %v2331_v21 }
  0x80   :  { %2226 = vmatpush3.bf16.msra.mxu0 %v2331_v21 }
  0x81   :  { %2227 = vmatprep.subr.bf16.mxu0 %v2334_v22 }
  0x84   :  { %2228 = vmatpush3.bf16.msra.mxu0 %v2334_v22 }
  0x85   :  { %2229 = vmatprep.subr.bf16.mxu0 %v2337_v23 }
  0x88   :  { %2230 = vmatpush3.bf16.msra.mxu0 %v2337_v23 }
  0x89   :  { %2231 = vmatprep.subr.bf16.mxu0 %v2340_v24 }
  0x8c   :  { %2232 = vmatpush3.bf16.msra.mxu0 %v2340_v24 }
  0x8d   :  { %2233 = vmatprep.subr.bf16.mxu0 %v2343_v27 }
  0x90   :  { %2234 = vmatpush3.bf16.msra.mxu0 %v2343_v27 }
  0x91   :  { %2235 = vmatprep.subr.bf16.mxu0 %v2346_v30 }
  0x94   :  { %2236 = vmatpush3.bf16.msra.mxu0 %v2346_v30 }
  0x95   :  { %2237 = vmatprep.subr.bf16.mxu0 %v2349_v33 }
  0x98   :  { %2238 = vmatpush3.bf16.msra.mxu0 %v2349_v33 }
 0x14e   :  { %v2221_v37 = vpop.f32.mrb[0].mxu0 }
 0x14f   :  { %v2730_v38 = vadd.f32 %v2221_v37, %v1928_v35  ;;  %v228_v39 = vpop.f32.mrb[1].mxu0 }
 0x150   :  { %v2732_v40 = vadd.f32 %v1928_v35, %v228_v39  ;;  %v2222_v41 = vpop.f32.mrb[2].mxu0 }
 0x151   :  { %v2734_v42 = vadd.f32 %v2222_v41, %v1928_v35  ;;  %v231_v43 = vpop.f32.mrb[3].mxu0  ;;  %v260_v50 = vrot.slane %v2730_v38, 1  ;;  %v245_v7 = vrot.slane %v2730_v38, 7 }
 0x152   :  { %v2737_v44 = vadd.f32 %v1928_v35, %v231_v43  ;;  %v243_v45 = vrot.slane %v2732_v40, 7  ;;  %v258_v46 = vrot.slane %v2732_v40, 1 }
 0x153   :  { %v261_v47 = vrot.slane %v2734_v42, 1  ;;  %v246_v49 = vrot.slane %v2734_v42, 7  ;;  %v275_v10 = vpack.c.bf16 %v2734_v42, %v2730_v38 }
 0x154   :  { %v272_v52 = vpack.c.bf16 %v2737_v44, %v2732_v40  ;;  %v244_v54 = vrot.slane %v2737_v44, 7  ;;  %v259_v57 = vrot.slane %v2737_v44, 1 }
 0x155   :  { %v253_v58 = vsel %vm249_vm0, %v246_v49, %v243_v45  ;;  %v263_v60 = vsel %vm262_vm1, %v260_v50, %v261_v47  ;;  %v266_v61 = vsel %vm262_vm1, %v261_v47, %v258_v46  ;;  %v250_v14 = vsel %vm249_vm0, %v245_v7, %v246_v49 }
 0x156   :  { %501 = vmatprep.mubr.bf16.mxu1 %v272_v52  ;;  %v252_v62 = vsel %vm249_vm0, %v243_v45, %v244_v54  ;;  %v254_v63 = vmul.f32 %v253_v58, %v2743_v48  ;;  %v264_v0 = vsel %vm262_vm1, %v259_v57, %v260_v50  ;;  %v265_v1 = vsel %vm262_vm1, %v258_v46, %v259_v57 }
 0x157   :  { %v255_v2 = vmul.f32 %v252_v62, %v2751_v53  ;;  %v267_v3 = vmul.f32 %v265_v1, %v2754_v55  ;;  %v268_v4 = vmul.f32 %v264_v0, %v2756_v56  ;;  %v269_v5 = vmul.f32 %v263_v60, %v2747_v51 }
 0x158   :  { %v270_v6 = vmul.f32 %v266_v61, %v2761_v59  ;;  %v251_v15 = vsel %vm249_vm0, %v244_v54, %v245_v7  ;;  %v257_v17 = vmul.f32 %v250_v14, %v2784_v13 }
 0x159   :  { %v271_v8 = vpack.c.bf16 %v255_v2, %v254_v63  ;;  %v273_v9 = vpack.c.bf16 %v268_v4, %v267_v3  ;;  %v256_v16 = vmul.f32 %v251_v15, %v2782_v12 }
 0x15a   :  { %v276_v11 = vpack.c.bf16 %v270_v6, %v269_v5 }
 0x15b   :  { %502 = vmatmul.mubr.bf16.vlgmr.msra.gmra.mrb[0].mxu1 %v271_v8  ;;  %2239 = vmatprep.mubr.bf16.mxu0 %v273_v9  ;;  %v274_v18 = vpack.c.bf16 %v257_v17, %v256_v16  ;;  %v2350_v17 = vld [vmem:[#allocation7 + $0x100] sm:$0xff]  }
 0x15c   :  { %509 = vmatprep.mubr.bf16.mxu1 %v275_v10  ;;  %2240 = vmatmul.mubr.bf16.vlgmr.msra.gmra.mrb[4].mxu0 %v276_v11 }
 0x15d   :  { %2089 = vmatprep.subr.bf16.mxu1 %v2350_v17 }
 0x163   :  { %510 = vmatmul.mubr.bf16.gmra.mrb[4].mxu1 %v274_v18  ;;  %v2351_v18 = vld [vmem:[#allocation7 + $0xc0] sm:$0xff]  }
 0x164   :  { %2090 = vmatpush3.bf16.msra.mxu1 %v2351_v18 }
 0x22e   :  { %v2067_v19 = vpop.f32.mrb[0].mxu1 }
 0x22f   :  { %v2068_v20 = vpop.f32.mrb[1].mxu1  ;;  %v2241_v21 = vpop.f32.mrb[4].mxu0 }
 0x230   :  { %v2069_v22 = vadd.f32 %v2068_v20, %v2067_v19  ;;  %v2070_v23 = vpop.f32.mrb[2].mxu1  ;;  %v552_v24 = vpop.f32.mrb[5].mxu0  ;;  %v2352_v19 = vld [vmem:[#allocation7 + $0x140] sm:$0xff]   ;;  %v2353_v20 = vld [vmem:[#allocation7 + $0x108] sm:$0xff]  }
 0x231   :  { %v2071_v25 = vpop.f32.mrb[3].mxu1  ;;  %v2242_v26 = vpop.f32.mrb[6].mxu0  ;;  %2243 = vmatprep.subr.bf16.mxu0 %v2352_v19  ;;  %2091 = vmatprep.subr.bf16.mxu1 %v2353_v20 }
 0x232   :  { %v2792_v27 = vadd.f32 %v2069_v22, %v552_v24  ;;  %v2072_v28 = vadd.f32 %v2071_v25, %v2070_v23  ;;  %v555_v29 = vpop.f32.mrb[7].mxu0  ;;  %2244 = vmatpush3.bf16.msra.mxu0 %v2352_v19  ;;  %v2355_v22 = vld [vmem:[#allocation7 + $0x148] sm:$0xff]   ;;  %v2356_v23 = vld [vmem:[#allocation7 + $0x110] sm:$0xff]  }
 0x233   :  { %2245 = vmatprep.subr.bf16.mxu0 %v2355_v22  ;;  %v2357_v24 = vld [vmem:[#allocation7 + $0xd0] sm:$0xff]  }
 0x234   :  { %v2794_v30 = vadd.f32 %v2072_v28, %v555_v29  ;;  %v576_v39 = vmul.f32 %v2792_v27, %v2792_v27  ;;  %v2358_v25 = vld [vmem:[#allocation7 + $0x150] sm:$0xff]   ;;  %v2360_v28 = vld [vmem:[#allocation7 + $0xd8] sm:$0xff]  }
 0x235   :  { %v2361_v29 = vld [vmem:[#allocation7 + $0x158] sm:$0xff]  }
 0x236   :  { %v2073_v31 = vpop.f32.mrb[4].mxu1  ;;  %v577_v33 = vmul.f32 %v2794_v30, %v2794_v30  ;;  %v567_v41 = vadd.f32 %v2794_v30, %v2792_v27  ;;  %2246 = vmatpush3.bf16.msra.mxu0 %v2355_v22 }
 0x237   :  { %v2074_v32 = vpop.f32.mrb[5].mxu1  ;;  %2247 = vmatprep.subr.bf16.mxu0 %v2358_v25 }
 0x238   :  { %v2075_v34 = vadd.f32 %v2074_v32, %v2073_v31  ;;  %v2076_v35 = vpop.f32.mrb[6].mxu1  ;;  %v580_v46 = vadd.f32 %v577_v33, %v576_v39  ;;  %v2362_v31 = vld [vmem:[#allocation7 + $0x120] sm:$0xff]   ;;  %v2368_v39 = vld [vmem:[#allocation7 + $0x130] sm:$0xff]  }
 0x239   :  { %v2077_v37 = vpop.f32.mrb[7].mxu1  ;;  %v2363_v32 = vld [vmem:[#allocation7 + $0xe0] sm:$0xff]  }
 0x23a   :  { %v2802_v43 = vadd.f32 %v2241_v21, %v2075_v34  ;;  %v2078_v45 = vadd.f32 %v2077_v37, %v2076_v35  ;;  %v2354_v21 = vld [vmem:[#allocation7 + $0xc8] sm:$0xff]   ;;  %2248 = vmatpush3.bf16.msra.mxu0 %v2358_v25  ;;  %v2364_v33 = vld [vmem:[#allocation7 + $0x160] sm:$0xff]  }
 0x23b   :  { %2092 = vmatpush3.bf16.msra.mxu1 %v2354_v21  ;;  %2249 = vmatprep.subr.bf16.mxu0 %v2361_v29  ;;  %v2365_v34 = vld [vmem:[#allocation7 + $0x128] sm:$0xff]  }
 0x23c   :  { %v568_v47 = vadd.f32 %v567_v41, %v2802_v43  ;;  %v578_v49 = vmul.f32 %v2802_v43, %v2802_v43  ;;  %v2807_v50 = vadd.f32 %v2242_v26, %v2078_v45  ;;  %2093 = vmatprep.subr.bf16.mxu1 %v2356_v23  ;;  %v2359_v26 = vld [vmem:[#allocation7 + $0x118] sm:$0xff]   ;;  %v2366_v35 = vld [vmem:[#allocation7 + $0xe8] sm:$0xff]   ;;  %v2369_v41 = vld [vmem:[#allocation7 + $0xf0] sm:$0xff]  }
 0x23d   :  { %v2367_v37 = vld [vmem:[#allocation7 + $0x168] sm:$0xff]   ;;  %v2370_v45 = vld [vmem:[#allocation7 + $0x170] sm:$0xff]  }
 0x23e   :  { %v581_v52 = vadd.f32 %v580_v46, %v578_v49  ;;  %v569_v54 = vadd.f32 %v568_v47, %v2807_v50  ;;  %v579_v57 = vmul.f32 %v2807_v50, %v2807_v50  ;;  %2250 = vmatpush3.bf16.msra.mxu0 %v2361_v29  ;;  %v2371_v46 = vld [vmem:[#allocation7 + $0x138] sm:$0xff]  }
 0x23f   :  { %2094 = vmatpush3.bf16.msra.mxu1 %v2357_v24  ;;  %2251 = vmatprep.subr.bf16.mxu0 %v2364_v33  ;;  %v2372_v47 = vld [vmem:[#allocation7 + $0xf8] sm:$0xff]  }
 0x240   :  { %v570_v58 = vrot.slane %v569_v54, 4  ;;  %v582_v60 = vadd.f32 %v581_v52, %v579_v57  ;;  %2095 = vmatprep.subr.bf16.mxu1 %v2359_v26  ;;  %v2373_v49 = vld [vmem:[#allocation7 + $0x178] sm:$0xff]  }
 0x242   :  { %v571_v61 = vadd.f32 %v570_v58, %v569_v54  ;;  %v583_v62 = vrot.slane %v582_v60, 4  ;;  %2252 = vmatpush3.bf16.msra.mxu0 %v2364_v33 }
 0x243   :  { %2096 = vmatpush3.bf16.msra.mxu1 %v2360_v28  ;;  %2253 = vmatprep.subr.bf16.mxu0 %v2367_v37 }
 0x244   :  { %v572_v63 = vrot.slane %v571_v61, 2  ;;  %v584_v0 = vadd.f32 %v583_v62, %v582_v60  ;;  %2097 = vmatprep.subr.bf16.mxu1 %v2362_v31 }
 0x246   :  { %v573_v1 = vadd.f32 %v572_v63, %v571_v61  ;;  %v585_v2 = vrot.slane %v584_v0, 2  ;;  %2254 = vmatpush3.bf16.msra.mxu0 %v2367_v37  ;;  %v2589_v63 = vmov 1966171168  }
 0x247   :  { %2098 = vmatpush3.bf16.msra.mxu1 %v2363_v32  ;;  %2255 = vmatprep.subr.bf16.mxu0 %v2370_v45 }
 0x248   :  { %v574_v3 = vrot.slane %v573_v1, 1  ;;  %v586_v4 = vadd.f32 %v585_v2, %v584_v0  ;;  %2099 = vmatprep.subr.bf16.mxu1 %v2365_v34  ;;  %v614_v0 = vunpack.c.l.s4 %v2589_v63 }
 0x24a   :  { %v587_v5 = vrot.slane %v586_v4, 1  ;;  %v575_v6 = vadd.f32 %v574_v3, %v573_v1  ;;  %2256 = vmatpush3.bf16.msra.mxu0 %v2370_v45  ;;  %v615_v1 = vunpack.c.0.s8 %v614_v0 }
 0x24b   :  { %2100 = vmatpush3.bf16.msra.mxu1 %v2366_v35  ;;  %2257 = vmatprep.subr.bf16.mxu0 %v2373_v49 }
 0x24c   :  { %v588_v7 = vadd.f32 %v587_v5, %v586_v4  ;;  %2101 = vmatprep.subr.bf16.mxu1 %v2368_v39  ;;  %v2818_v2 = vsub.s32 %v615_v1, %v2728_v36 }
 0x24e   :  { %v590_v8 = vsel %vm589_vm2, %v575_v6, %v588_v7  ;;  %2258 = vmatpush3.bf16.msra.mxu0 %v2373_v49  ;;  %v609_v6 = vld [vmem:[%s3051_s4] sm:$0x1]  ;;  %v2825_v7 = vsub.s32 0, %v2728_v36 }
 0x24f   :  { %591 = vrot.lane.b32.xlu0 %v590_v8, %s2583_s28  ;;  %2102 = vmatpush3.bf16.msra.mxu1 %v2369_v41 }
 0x250   :  { %2103 = vmatprep.subr.bf16.mxu1 %v2371_v46 }
 0x253   :  { %2104 = vmatpush3.bf16.msra.mxu1 %v2372_v47 }
 0x2c1   :  { %v592_v9 = vpop.permute.xlu0 %591 }
 0x2c2   :  { %v593_v10 = vadd.f32 %v592_v9, %v590_v8 }
 0x2c4   :  { %594 = vrot.lane.b32.xlu0 %v593_v10, %s2587_s2 }
 0x336   :  { %v595_v11 = vpop.permute.xlu0 %594 }
 0x337   :  { %v596_v14 = vadd.f32 %v595_v11, %v593_v10  ;;  %v630_v10 = vld [vmem:[%s3052_s5] sm:$0x1] }
 0x339   :  { %597 = vrot.lane.b32.xlu1 %v596_v14, %s2588_s25 }
 0x3ab   :  { %v598_v15 = vpop.permute.xlu1 %597 }
 0x3ac   :  { %v599_v16 = vadd.f32 %v598_v15, %v596_v14 }
 0x3ae   :  { %600 = vrot.lane.b32.xlu1 %v599_v16, %s2580_s17 }
 0x420   :  { %v601_v52 = vpop.permute.xlu1 %600 }
 0x421   :  { %v602_v54 = vadd.f32 %v601_v52, %v599_v16 }
 0x423   :  { %v603_v57 = vmul.f32 0.001953125, %v602_v54 }
 0x425   :  { %v604_v58 = vmul.f32 %v603_v57, %v603_v57 }
 0x427   :  { %v606_v60 = vrot.slane %v604_v58, 7 }
 0x429   :  { %v608_v61 = vsub.f32 %v603_v57, %v606_v60 }
 0x42b   :  { %v610_v62 = vadd.f32 1e-05, %v608_v61 }
 0x42d   :  { %2422 = vrsqrt.f32 %v610_v62 }
 0x437   :  { %v2423_v3 = vpop.eup %2422 }
 0x438   :  { %v619_v4 = vrot.slane %v2423_v3, %v2818_v2 }
 0x43a   :  { %v620_v5 = vcombine.high %v619_v4, %v619_v4 }
 0x43c   :  { %v627_v8 = vrot.slane %v620_v5, %v2818_v2 }
 0x43e   :  { %v629_v9 = vmul.f32 %v627_v8, %v609_v6 }
 0x440   :  { %v631_v11 = vmul.f32 %v629_v9, %v603_v57  ;;  %v637_v14 = vrot.slane %v629_v9, %v2825_v7 }
 0x442   :  { %v632_v15 = vsub.f32 %v630_v10, %v631_v11  ;;  %v641_v16 = vmul.f32 %v637_v14, %v2802_v43  ;;  %v642_v17 = vmul.f32 %v637_v14, %v2807_v50  ;;  %v639_v19 = vmul.f32 %v637_v14, %v2792_v27 }
 0x443   :  { %v640_v20 = vmul.f32 %v637_v14, %v2794_v30 }
 0x444   :  { %v647_v18 = vrot.slane %v632_v15, %v2825_v7 }
 0x446   :  { %v651_v21 = vadd.f32 %v647_v18, %v641_v16  ;;  %v652_v22 = vadd.f32 %v647_v18, %v642_v17  ;;  %v649_v23 = vadd.f32 %v647_v18, %v639_v19  ;;  %v650_v24 = vadd.f32 %v647_v18, %v640_v20 }
 0x448   :  { %v656_v25 = vmax.f32 %v652_v22, 0.0  ;;  %v653_v26 = vmax.f32 %v649_v23, 0.0  ;;  %v654_v28 = vmax.f32 %v650_v24, 0.0  ;;  %v655_v29 = vmax.f32 %v651_v21, 0.0 }
 0x44a   :  { %v660_v31 = vadd.f32 %v656_v25, %v2734_v42  ;;  %v657_v43 = vadd.f32 %v653_v26, %v2732_v40  ;;  %v658_v50 = vadd.f32 %v654_v28, %v2737_v44  ;;  %v659_v32 = vadd.f32 %v655_v29, %v2730_v38 }
 0x44c   :  { %v661_v33 = vrot.slane %v657_v43, 7  ;;  %v662_v27 = vrot.slane %v658_v50, 7  ;;  %v686_v34 = vpack.c.bf16 %v658_v50, %v657_v43  ;;  %v664_v30 = vrot.slane %v660_v31, 7 }
 0x44d   :  { %v673_v35 = vrot.slane %v657_v43, 1  ;;  %v674_v37 = vrot.slane %v658_v50, 1  ;;  %v675_v39 = vrot.slane %v659_v32, 1  ;;  %v676_v46 = vrot.slane %v660_v31, 1 }
 0x44e   :  { %916 = vmatprep.mubr.bf16.mxu1 %v686_v34  ;;  %v667_v41 = vsel %vm249_vm0, %v661_v33, %v662_v27  ;;  %v668_v45 = vsel %vm249_vm0, %v664_v30, %v661_v33  ;;  %v663_v47 = vrot.slane %v659_v32, 7  ;;  %v689_v4 = vpack.c.bf16 %v660_v31, %v659_v32 }
 0x44f   :  { %v669_v49 = vmul.f32 %v668_v45, %v2743_v48  ;;  %v670_v52 = vmul.f32 %v667_v41, %v2751_v53  ;;  %v678_v54 = vsel %vm262_vm1, %v674_v37, %v675_v39  ;;  %v679_v57 = vsel %vm262_vm1, %v673_v35, %v674_v37 }
 0x450   :  { %v681_v58 = vmul.f32 %v679_v57, %v2754_v55  ;;  %v682_v60 = vmul.f32 %v678_v54, %v2756_v56  ;;  %v677_v61 = vsel %vm262_vm1, %v675_v39, %v676_v46  ;;  %v680_v62 = vsel %vm262_vm1, %v676_v46, %v673_v35 }
 0x451   :  { %v685_v63 = vpack.c.bf16 %v670_v52, %v669_v49  ;;  %v683_v0 = vmul.f32 %v677_v61, %v2747_v51  ;;  %v684_v1 = vmul.f32 %v680_v62, %v2761_v59  ;;  %v665_v5 = vsel %vm249_vm0, %v663_v47, %v664_v30 }
 0x452   :  { %v687_v3 = vpack.c.bf16 %v682_v60, %v681_v58  ;;  %v666_v6 = vsel %vm249_vm0, %v662_v27, %v663_v47  ;;  %v672_v10 = vmul.f32 %v665_v5, %v2784_v13 }
 0x453   :  { %917 = vmatmul.mubr.bf16.vlgmr.msra.gmra.mrb[8].mxu1 %v685_v63  ;;  %v690_v8 = vpack.c.bf16 %v684_v1, %v683_v0  ;;  %v671_v9 = vmul.f32 %v666_v6, %v2782_v12 }
 0x454   :  { %2259 = vmatprep.mubr.bf16.mxu0 %v687_v3  ;;  %924 = vmatprep.mubr.bf16.mxu1 %v689_v4 }
 0x455   :  { %2260 = vmatmul.mubr.bf16.vlgmr.msra.gmra.mrb[8].mxu0 %v690_v8  ;;  %v688_v11 = vpack.c.bf16 %v672_v10, %v671_v9 }
 0x45b   :  { %925 = vmatmul.mubr.bf16.gmra.mrb[12].mxu1 %v688_v11 }
 0x526   :  { %v2105_v14 = vpop.f32.mrb[8].mxu1 }
 0x527   :  { %v2106_v15 = vpop.f32.mrb[9].mxu1 }
 0x528   :  { %v2107_v16 = vadd.f32 %v2106_v15, %v2105_v14  ;;  %v2261_v17 = vpop.f32.mrb[8].mxu0  ;;  %v2108_v18 = vpop.f32.mrb[10].mxu1  ;;  %v2374_v14 = vld [vmem:[#allocation7 + $0x1c0] sm:$0xff]  }
 0x529   :  { %v967_v19 = vpop.f32.mrb[9].mxu0  ;;  %v2109_v20 = vpop.f32.mrb[11].mxu1  ;;  %v2375_v15 = vld [vmem:[#allocation7 + $0x180] sm:$0xff]   ;;  %2127 = vmatprep.subr.bf16.mxu1 %v2374_v14 }
 0x52a   :  { %v2865_v21 = vadd.f32 %v2107_v16, %v967_v19  ;;  %v2110_v22 = vadd.f32 %v2109_v20, %v2108_v18  ;;  %v2262_v23 = vpop.f32.mrb[10].mxu0  ;;  %v2376_v16 = vld [vmem:[#allocation7 + $0x200] sm:$0xff]   ;;  %2128 = vmatpush3.bf16.msra.mxu1 %v2375_v15  ;;  %v2378_v18 = vld [vmem:[#allocation7 + $0x188] sm:$0xff]   ;;  %v2380_v20 = vld [vmem:[#allocation7 + $0x1d0] sm:$0xff]  }
 0x52b   :  { %v970_v24 = vpop.f32.mrb[11].mxu0  ;;  %2263 = vmatprep.subr.bf16.mxu0 %v2376_v16  ;;  %v2379_v19 = vld [vmem:[#allocation7 + $0x208] sm:$0xff]  }
 0x52c   :  { %v2867_v25 = vadd.f32 %v2110_v22, %v970_v24  ;;  %v991_v32 = vmul.f32 %v2865_v21, %v2865_v21  ;;  %2264 = vmatpush3.bf16.msra.mxu0 %v2376_v16  ;;  %v2381_v22 = vld [vmem:[#allocation7 + $0x190] sm:$0xff]   ;;  %v2383_v24 = vld [vmem:[#allocation7 + $0x1d8] sm:$0xff]  }
 0x52d   :  { %2265 = vmatprep.subr.bf16.mxu0 %v2379_v19 }
 0x52e   :  { %v2111_v26 = vpop.f32.mrb[12].mxu1  ;;  %v992_v29 = vmul.f32 %v2867_v25, %v2867_v25  ;;  %v982_v33 = vadd.f32 %v2867_v25, %v2865_v21 }
 0x52f   :  { %v2112_v28 = vpop.f32.mrb[13].mxu1 }
 0x530   :  { %v2113_v31 = vadd.f32 %v2112_v28, %v2111_v26  ;;  %v2114_v43 = vpop.f32.mrb[14].mxu1  ;;  %v995_v30 = vadd.f32 %v992_v29, %v991_v32  ;;  %2266 = vmatpush3.bf16.msra.mxu0 %v2379_v19  ;;  %v2384_v26 = vld [vmem:[#allocation7 + $0x198] sm:$0xff]   ;;  %v2386_v29 = vld [vmem:[#allocation7 + $0x1e0] sm:$0xff]   ;;  %v2390_v32 = vld [vmem:[#allocation7 + $0x1a8] sm:$0xff]  }
 0x531   :  { %v2115_v50 = vpop.f32.mrb[15].mxu1  ;;  %v2385_v28 = vld [vmem:[#allocation7 + $0x218] sm:$0xff]  }
 0x532   :  { %v2875_v27 = vadd.f32 %v2261_v17, %v2113_v31  ;;  %v2116_v34 = vadd.f32 %v2115_v50, %v2114_v43  ;;  %v2377_v17 = vld [vmem:[#allocation7 + $0x1c8] sm:$0xff]   ;;  %v2387_v31 = vld [vmem:[#allocation7 + $0x1a0] sm:$0xff]  }
 0x533   :  { %2129 = vmatprep.subr.bf16.mxu1 %v2377_v17  ;;  %v2388_v43 = vld [vmem:[#allocation7 + $0x220] sm:$0xff]   ;;  %v2389_v50 = vld [vmem:[#allocation7 + $0x1e8] sm:$0xff]  }
 0x534   :  { %v983_v35 = vadd.f32 %v982_v33, %v2875_v27  ;;  %v993_v37 = vmul.f32 %v2875_v27, %v2875_v27  ;;  %v2880_v39 = vadd.f32 %v2262_v23, %v2116_v34  ;;  %2130 = vmatpush3.bf16.msra.mxu1 %v2378_v18  ;;  %v2382_v23 = vld [vmem:[#allocation7 + $0x210] sm:$0xff]   ;;  %v2391_v33 = vld [vmem:[#allocation7 + $0x228] sm:$0xff]  }
 0x535   :  { %2131 = vmatprep.subr.bf16.mxu1 %v2380_v20  ;;  %2267 = vmatprep.subr.bf16.mxu0 %v2382_v23  ;;  %v2392_v34 = vld [vmem:[#allocation7 + $0x1f0] sm:$0xff]  }
 0x536   :  { %v996_v41 = vadd.f32 %v995_v30, %v993_v37  ;;  %v984_v45 = vadd.f32 %v983_v35, %v2880_v39  ;;  %v994_v46 = vmul.f32 %v2880_v39, %v2880_v39  ;;  %2268 = vmatpush3.bf16.msra.mxu0 %v2382_v23  ;;  %v2394_v30 = vld [vmem:[#allocation7 + $0x230] sm:$0xff]   ;;  %v2395_v37 = vld [vmem:[#allocation7 + $0x1f8] sm:$0xff]  }
 0x537   :  { %2269 = vmatprep.subr.bf16.mxu0 %v2385_v28  ;;  %v2393_v35 = vld [vmem:[#allocation7 + $0x1b0] sm:$0xff]  }
 0x538   :  { %v985_v47 = vrot.slane %v984_v45, 4  ;;  %v997_v49 = vadd.f32 %v996_v41, %v994_v46  ;;  %2132 = vmatpush3.bf16.msra.mxu1 %v2381_v22  ;;  %v2397_v41 = vld [vmem:[#allocation7 + $0x238] sm:$0xff]  }
 0x539   :  { %2133 = vmatprep.subr.bf16.mxu1 %v2383_v24 }
 0x53a   :  { %v986_v52 = vadd.f32 %v985_v47, %v984_v45  ;;  %v998_v54 = vrot.slane %v997_v49, 4  ;;  %2270 = vmatpush3.bf16.msra.mxu0 %v2385_v28  ;;  %v2396_v45 = vld [vmem:[#allocation7 + $0x1b8] sm:$0xff]  }
 0x53b   :  { %2271 = vmatprep.subr.bf16.mxu0 %v2388_v43 }
 0x53c   :  { %v987_v57 = vrot.slane %v986_v52, 2  ;;  %v999_v58 = vadd.f32 %v998_v54, %v997_v49  ;;  %2134 = vmatpush3.bf16.msra.mxu1 %v2384_v26 }
 0x53d   :  { %2135 = vmatprep.subr.bf16.mxu1 %v2386_v29 }
 0x53e   :  { %v988_v60 = vadd.f32 %v987_v57, %v986_v52  ;;  %v1000_v61 = vrot.slane %v999_v58, 2  ;;  %2272 = vmatpush3.bf16.msra.mxu0 %v2388_v43 }
 0x53f   :  { %2273 = vmatprep.subr.bf16.mxu0 %v2391_v33 }
 0x540   :  { %v989_v62 = vrot.slane %v988_v60, 1  ;;  %v1001_v63 = vadd.f32 %v1000_v61, %v999_v58  ;;  %2136 = vmatpush3.bf16.msra.mxu1 %v2387_v31 }
 0x541   :  { %2137 = vmatprep.subr.bf16.mxu1 %v2389_v50 }
 0x542   :  { %v1002_v0 = vrot.slane %v1001_v63, 1  ;;  %v990_v1 = vadd.f32 %v989_v62, %v988_v60  ;;  %2274 = vmatpush3.bf16.msra.mxu0 %v2391_v33 }
 0x543   :  { %2275 = vmatprep.subr.bf16.mxu0 %v2394_v30 }
 0x544   :  { %v1003_v3 = vadd.f32 %v1002_v0, %v1001_v63  ;;  %2138 = vmatpush3.bf16.msra.mxu1 %v2390_v32  ;;  %v1987_v63 = vld [vmem:[%s3051_s4 + $0x1] sm:$0x1] }
 0x545   :  { %2139 = vmatprep.subr.bf16.mxu1 %v2392_v34 }
 0x546   :  { %v1004_v4 = vsel %vm589_vm2, %v990_v1, %v1003_v3  ;;  %2276 = vmatpush3.bf16.msra.mxu0 %v2394_v30  ;;  %v1988_v3 = vld [vmem:[%s3052_s5 + $0x1] sm:$0x1] }
 0x547   :  { %1005 = vrot.lane.b32.xlu0 %v1004_v4, %s2583_s28  ;;  %2277 = vmatprep.subr.bf16.mxu0 %v2397_v41 }
 0x548   :  { %2140 = vmatpush3.bf16.msra.mxu1 %v2393_v35 }
 0x549   :  { %2141 = vmatprep.subr.bf16.mxu1 %v2395_v37 }
 0x54a   :  { %2278 = vmatpush3.bf16.msra.mxu0 %v2397_v41 }
 0x54c   :  { %2142 = vmatpush3.bf16.msra.mxu1 %v2396_v45 }
 0x5b9   :  { %v1006_v5 = vpop.permute.xlu0 %1005 }
 0x5ba   :  { %v1007_v6 = vadd.f32 %v1006_v5, %v1004_v4 }
 0x5bc   :  { %1008 = vrot.lane.b32.xlu1 %v1007_v6, %s2587_s2 }
 0x62e   :  { %v1009_v8 = vpop.permute.xlu1 %1008 }
 0x62f   :  { %v1010_v9 = vadd.f32 %v1009_v8, %v1007_v6 }
 0x631   :  { %1011 = vrot.lane.b32.xlu0 %v1010_v9, %s2588_s25 }
 0x6a3   :  { %v1012_v10 = vpop.permute.xlu0 %1011 }
 0x6a4   :  { %v1013_v11 = vadd.f32 %v1012_v10, %v1010_v9 }
 0x6a6   :  { %1014 = vrot.lane.b32.xlu1 %v1013_v11, %s2580_s17 }
 0x718   :  { %v1015_v46 = vpop.permute.xlu1 %1014 }
 0x719   :  { %v1016_v47 = vadd.f32 %v1015_v46, %v1013_v11 }
 0x71b   :  { %v1017_v49 = vmul.f32 0.001953125, %v1016_v47 }
 0x71d   :  { %v1018_v52 = vmul.f32 %v1017_v49, %v1017_v49 }
 0x71f   :  { %v1020_v54 = vrot.slane %v1018_v52, 7 }
 0x721   :  { %v1022_v57 = vsub.f32 %v1017_v49, %v1020_v54 }
 0x723   :  { %v1025_v58 = vadd.f32 1e-05, %v1022_v57 }
 0x725   :  { %2424 = vrsqrt.f32 %v1025_v58 }
 0x72f   :  { %v2425_v60 = vpop.eup %2424 }
 0x730   :  { %v1034_v61 = vrot.slane %v2425_v60, %v2818_v2 }
 0x732   :  { %v1035_v62 = vcombine.high %v1034_v61, %v1034_v61 }
 0x734   :  { %v1042_v0 = vrot.slane %v1035_v62, %v2818_v2 }
 0x736   :  { %v1044_v1 = vmul.f32 %v1987_v63, %v1042_v0 }
 0x738   :  { %v1047_v4 = vmul.f32 %v1044_v1, %v1017_v49  ;;  %v1053_v5 = vrot.slane %v1044_v1, %v2825_v7 }
 0x73a   :  { %v1048_v6 = vsub.f32 %v1988_v3, %v1047_v4  ;;  %v1057_v8 = vmul.f32 %v1053_v5, %v2875_v27  ;;  %v1058_v9 = vmul.f32 %v1053_v5, %v2880_v39  ;;  %v1055_v11 = vmul.f32 %v1053_v5, %v2865_v21 }
 0x73b   :  { %v1056_v14 = vmul.f32 %v1053_v5, %v2867_v25 }
 0x73c   :  { %v1063_v10 = vrot.slane %v1048_v6, %v2825_v7 }
 0x73e   :  { %v1067_v15 = vadd.f32 %v1063_v10, %v1057_v8  ;;  %v1068_v16 = vadd.f32 %v1063_v10, %v1058_v9  ;;  %v1065_v17 = vadd.f32 %v1063_v10, %v1055_v11  ;;  %v1066_v18 = vadd.f32 %v1063_v10, %v1056_v14 }
 0x740   :  { %v2904_v19 = vmax.f32 %v1067_v15, 0.0  ;;  %v2906_v20 = vmax.f32 %v1068_v16, 0.0  ;;  %v2908_v22 = vmax.f32 %v1065_v17, 0.0  ;;  %v2910_v23 = vmax.f32 %v1066_v18, 0.0 }
 0x742   :  { %v1098_v27 = vpack.c.bf16 %v2910_v23, %v2908_v22  ;;  %v1073_v39 = vrot.slane %v2908_v22, 7  ;;  %v1074_v21 = vrot.slane %v2910_v23, 7  ;;  %v1076_v25 = vrot.slane %v2906_v20, 7 }
 0x743   :  { %v1085_v24 = vrot.slane %v2908_v22, 1  ;;  %v1086_v26 = vrot.slane %v2910_v23, 1  ;;  %v1087_v28 = vrot.slane %v2904_v19, 1  ;;  %v1088_v43 = vrot.slane %v2906_v20, 1 }
 0x744   :  { %1328 = vmatprep.mubr.bf16.mxu1 %v1098_v27  ;;  %v1079_v29 = vsel %vm249_vm0, %v1073_v39, %v1074_v21  ;;  %v1080_v31 = vsel %vm249_vm0, %v1076_v25, %v1073_v39  ;;  %v1075_v50 = vrot.slane %v2904_v19, 7  ;;  %v1101_v49 = vpack.c.bf16 %v2906_v20, %v2904_v19 }
 0x745   :  { %v1081_v32 = vmul.f32 %v1080_v31, %v2743_v48  ;;  %v1082_v33 = vmul.f32 %v1079_v29, %v2751_v53  ;;  %v1090_v34 = vsel %vm262_vm1, %v1086_v26, %v1087_v28  ;;  %v1091_v30 = vsel %vm262_vm1, %v1085_v24, %v1086_v26 }
 0x746   :  { %v1093_v35 = vmul.f32 %v1091_v30, %v2754_v55  ;;  %v1094_v37 = vmul.f32 %v1090_v34, %v2756_v56  ;;  %v1089_v41 = vsel %vm262_vm1, %v1087_v28, %v1088_v43  ;;  %v1092_v45 = vsel %vm262_vm1, %v1088_v43, %v1085_v24 }
 0x747   :  { %v1097_v46 = vpack.c.bf16 %v1082_v33, %v1081_v32  ;;  %v1095_v48 = vmul.f32 %v1089_v41, %v2747_v51  ;;  %v1096_v53 = vmul.f32 %v1092_v45, %v2761_v59  ;;  %v1077_v55 = vsel %vm249_vm0, %v1075_v50, %v1076_v25 }
 0x748   :  { %v1099_v47 = vpack.c.bf16 %v1094_v37, %v1093_v35  ;;  %v1078_v56 = vsel %vm249_vm0, %v1074_v21, %v1075_v50  ;;  %v1084_v51 = vmul.f32 %v1077_v55, %v2784_v13 }
 0x749   :  { %1329 = vmatmul.mubr.bf16.vlgmr.msra.gmra.mrb[16].mxu1 %v1097_v46  ;;  %v1102_v52 = vpack.c.bf16 %v1096_v53, %v1095_v48  ;;  %v1083_v54 = vmul.f32 %v1078_v56, %v2782_v12 }
 0x74a   :  { %2279 = vmatprep.mubr.bf16.mxu0 %v1099_v47  ;;  %1336 = vmatprep.mubr.bf16.mxu1 %v1101_v49 }
 0x74b   :  { %2280 = vmatmul.mubr.bf16.vlgmr.msra.gmra.mrb[12].mxu0 %v1102_v52  ;;  %v1100_v59 = vpack.c.bf16 %v1084_v51, %v1083_v54  ;;  %v2398_v52 = vld [vmem:[#allocation7 + $0x280] sm:$0xff]  }
 0x74c   :  { %v2399_v54 = vld [vmem:[#allocation7 + $0x240] sm:$0xff]   ;;  %2165 = vmatprep.subr.bf16.mxu1 %v2398_v52 }
 0x74d   :  { %v2400_v51 = vld [vmem:[#allocation7 + $0x2c0] sm:$0xff]   ;;  %2166 = vmatpush3.bf16.msra.mxu1 %v2399_v54 }
 0x74e   :  { %2283 = vmatprep.subr.bf16.mxu0 %v2400_v51 }
 0x74f   :  { %2284 = vmatpush3.bf16.msra.mxu0 %v2400_v51 }
 0x751   :  { %1337 = vmatmul.mubr.bf16.gmra.mrb[20].mxu1 %v1100_v59  ;;  %v2401_v59 = vld [vmem:[#allocation7 + $0x288] sm:$0xff]  }
 0x752   :  { %2167 = vmatprep.subr.bf16.mxu1 %v2401_v59 }
 0x81c   :  { %v2143_v57 = vpop.f32.mrb[16].mxu1 }
 0x81d   :  { %v2144_v58 = vpop.f32.mrb[17].mxu1 }
 0x81e   :  { %v2145_v60 = vadd.f32 %v2144_v58, %v2143_v57  ;;  %v2281_v61 = vpop.f32.mrb[12].mxu0  ;;  %v2146_v62 = vpop.f32.mrb[18].mxu1  ;;  %v2402_v57 = vld [vmem:[#allocation7 + $0x248] sm:$0xff]  }
 0x81f   :  { %v1379_v63 = vpop.f32.mrb[13].mxu0  ;;  %v2147_v0 = vpop.f32.mrb[19].mxu1  ;;  %v2403_v58 = vld [vmem:[#allocation7 + $0x2c8] sm:$0xff]   ;;  %2168 = vmatpush3.bf16.msra.mxu1 %v2402_v57 }
 0x820   :  { %v2948_v1 = vadd.f32 %v2145_v60, %v1379_v63  ;;  %v2148_v3 = vadd.f32 %v2147_v0, %v2146_v62  ;;  %v2282_v4 = vpop.f32.mrb[14].mxu0  ;;  %2285 = vmatprep.subr.bf16.mxu0 %v2403_v58  ;;  %v2404_v60 = vld [vmem:[#allocation7 + $0x290] sm:$0xff]   ;;  %v2407_v63 = vld [vmem:[#allocation7 + $0x298] sm:$0xff]  }
 0x821   :  { %v1382_v5 = vpop.f32.mrb[15].mxu0  ;;  %2286 = vmatpush3.bf16.msra.mxu0 %v2403_v58  ;;  %v2406_v62 = vld [vmem:[#allocation7 + $0x2d0] sm:$0xff]   ;;  %2169 = vmatprep.subr.bf16.mxu1 %v2404_v60  ;;  %v2408_v0 = vld [vmem:[#allocation7 + $0x258] sm:$0xff]  }
 0x822   :  { %v2950_v6 = vadd.f32 %v2148_v3, %v1382_v5  ;;  %v1403_v14 = vmul.f32 %v2948_v1, %v2948_v1  ;;  %2287 = vmatprep.subr.bf16.mxu0 %v2406_v62  ;;  %v2409_v3 = vld [vmem:[#allocation7 + $0x2d8] sm:$0xff]   ;;  %v2411_v5 = vld [vmem:[#allocation7 + $0x260] sm:$0xff]  }
 0x824   :  { %v2149_v8 = vpop.f32.mrb[20].mxu1  ;;  %v1404_v13 = vmul.f32 %v2950_v6, %v2950_v6  ;;  %v1394_v15 = vadd.f32 %v2950_v6, %v2948_v1 }
 0x825   :  { %v2150_v12 = vpop.f32.mrb[21].mxu1  ;;  %2288 = vmatpush3.bf16.msra.mxu0 %v2406_v62 }
 0x826   :  { %v2151_v9 = vadd.f32 %v2150_v12, %v2149_v8  ;;  %v2152_v10 = vpop.f32.mrb[22].mxu1  ;;  %v1407_v18 = vadd.f32 %v1404_v13, %v1403_v14  ;;  %2289 = vmatprep.subr.bf16.mxu0 %v2409_v3  ;;  %v2412_v8 = vld [vmem:[#allocation7 + $0x2e0] sm:$0xff]   ;;  %v2413_v12 = vld [vmem:[#allocation7 + $0x2a8] sm:$0xff]   ;;  %v2417_v14 = vld [vmem:[#allocation7 + $0x270] sm:$0xff]  }
 0x827   :  { %v2153_v11 = vpop.f32.mrb[23].mxu1  ;;  %v2414_v13 = vld [vmem:[#allocation7 + $0x268] sm:$0xff]  }
 0x828   :  { %v2958_v16 = vadd.f32 %v2281_v61, %v2151_v9  ;;  %v2154_v17 = vadd.f32 %v2153_v11, %v2152_v10  ;;  %v2405_v61 = vld [vmem:[#allocation7 + $0x250] sm:$0xff]   ;;  %v2415_v9 = vld [vmem:[#allocation7 + $0x2e8] sm:$0xff]  }
 0x829   :  { %2170 = vmatpush3.bf16.msra.mxu1 %v2405_v61  ;;  %2290 = vmatpush3.bf16.msra.mxu0 %v2409_v3  ;;  %v2416_v10 = vld [vmem:[#allocation7 + $0x2b0] sm:$0xff]  }
 0x82a   :  { %v1395_v27 = vadd.f32 %v1394_v15, %v2958_v16  ;;  %v1405_v39 = vmul.f32 %v2958_v16, %v2958_v16  ;;  %v2963_v21 = vadd.f32 %v2282_v4, %v2154_v17  ;;  %2171 = vmatprep.subr.bf16.mxu1 %v2407_v63  ;;  %v2410_v4 = vld [vmem:[#allocation7 + $0x2a0] sm:$0xff]   ;;  %2291 = vmatprep.subr.bf16.mxu0 %v2412_v8  ;;  %v2418_v11 = vld [vmem:[#allocation7 + $0x2f0] sm:$0xff]   ;;  %v2419_v15 = vld [vmem:[#allocation7 + $0x2b8] sm:$0xff]  }
 0x82b   :  { %v2421_v17 = vld [vmem:[#allocation7 + $0x2f8] sm:$0xff]  }
 0x82c   :  { %v1408_v25 = vadd.f32 %v1407_v18, %v1405_v39  ;;  %v1396_v24 = vadd.f32 %v1395_v27, %v2963_v21  ;;  %v1406_v26 = vmul.f32 %v2963_v21, %v2963_v21  ;;  %v2420_v18 = vld [vmem:[#allocation7 + $0x278] sm:$0xff]  }
 0x82d   :  { %2172 = vmatpush3.bf16.msra.mxu1 %v2408_v0  ;;  %2292 = vmatpush3.bf16.msra.mxu0 %v2412_v8  ;;  %v2430_v8 = vld [vmem:[#allocation8] sm:$0xff] }
 0x82e   :  { %v1397_v28 = vrot.slane %v1396_v24, 4  ;;  %v1409_v29 = vadd.f32 %v1408_v25, %v1406_v26  ;;  %2173 = vmatprep.subr.bf16.mxu1 %v2410_v4  ;;  %2293 = vmatprep.subr.bf16.mxu0 %v2415_v9 }
 0x830   :  { %v1398_v31 = vadd.f32 %v1397_v28, %v1396_v24  ;;  %v1410_v43 = vrot.slane %v1409_v29, 4 }
 0x831   :  { %2174 = vmatpush3.bf16.msra.mxu1 %v2411_v5  ;;  %2294 = vmatpush3.bf16.msra.mxu0 %v2415_v9 }
 0x832   :  { %v1399_v50 = vrot.slane %v1398_v31, 2  ;;  %v1411_v32 = vadd.f32 %v1410_v43, %v1409_v29  ;;  %2175 = vmatprep.subr.bf16.mxu1 %v2413_v12  ;;  %2295 = vmatprep.subr.bf16.mxu0 %v2418_v11  ;;  %v2431_v12 = vld [vmem:[#allocation8 + $0x8] sm:$0xff] }
 0x834   :  { %v1400_v33 = vadd.f32 %v1399_v50, %v1398_v31  ;;  %v1412_v34 = vrot.slane %v1411_v32, 2 }
 0x835   :  { %2176 = vmatpush3.bf16.msra.mxu1 %v2414_v13  ;;  %2296 = vmatpush3.bf16.msra.mxu0 %v2418_v11 }
 0x836   :  { %v1401_v30 = vrot.slane %v1400_v33, 1  ;;  %v1413_v35 = vadd.f32 %v1412_v34, %v1411_v32  ;;  %2177 = vmatprep.subr.bf16.mxu1 %v2416_v10  ;;  %2297 = vmatprep.subr.bf16.mxu0 %v2421_v17  ;;  %v2013_v32 = vld [vmem:[%s3051_s4 + $0x2] sm:$0x1]  ;;  %v2432_v10 = vld [vmem:[#allocation10] sm:$0xff] }
 0x838   :  { %v1414_v37 = vrot.slane %v1413_v35, 1  ;;  %v1402_v41 = vadd.f32 %v1401_v30, %v1400_v33  ;;  %v2014_v30 = vld [vmem:[%s3052_s5 + $0x2] sm:$0x1] }
 0x839   :  { %2178 = vmatpush3.bf16.msra.mxu1 %v2417_v14  ;;  %2298 = vmatpush3.bf16.msra.mxu0 %v2421_v17  ;;  %v2433_v14 = vld [vmem:[#allocation10 + $0x8] sm:$0xff] }
 0x83a   :  { %v1415_v45 = vadd.f32 %v1414_v37, %v1413_v35  ;;  %2179 = vmatprep.subr.bf16.mxu1 %v2419_v15 }
 0x83c   :  { %v1416_v46 = vsel %vm589_vm2, %v1402_v41, %v1415_v45 }
 0x83d   :  { %1417 = vrot.lane.b32.xlu0 %v1416_v46, %s2583_s28  ;;  %2180 = vmatpush3.bf16.msra.mxu1 %v2420_v18 }
 0x8af   :  { %v1418_v48 = vpop.permute.xlu0 %1417 }
 0x8b0   :  { %v1419_v53 = vadd.f32 %v1418_v48, %v1416_v46 }
 0x8b2   :  { %1420 = vrot.lane.b32.xlu1 %v1419_v53, %s2587_s2 }
 0x924   :  { %v1421_v47 = vpop.permute.xlu1 %1420 }
 0x925   :  { %v1422_v49 = vadd.f32 %v1421_v47, %v1419_v53 }
 0x927   :  { %1423 = vrot.lane.b32.xlu0 %v1422_v49, %s2588_s25 }
 0x999   :  { %v1424_v55 = vpop.permute.xlu0 %1423 }
 0x99a   :  { %v1425_v56 = vadd.f32 %v1424_v55, %v1422_v49 }
 0x99c   :  { %1426 = vrot.lane.b32.xlu1 %v1425_v56, %s2580_s17 }
 0xa0e   :  { %v1427_v27 = vpop.permute.xlu1 %1426 }
 0xa0f   :  { %v1428_v39 = vadd.f32 %v1427_v27, %v1425_v56 }
 0xa11   :  { %v1429_v25 = vmul.f32 0.001953125, %v1428_v39  ;;  %v2434_v39 = vld [vmem:[#allocation10 + $0x10] sm:$0xff] }
 0xa13   :  { %v1430_v24 = vmul.f32 %v1429_v25, %v1429_v25 }
 0xa15   :  { %v1432_v26 = vrot.slane %v1430_v24, 7  ;;  %v2435_v24 = vld [vmem:[#allocation10 + $0x18] sm:$0xff] }
 0xa17   :  { %v1434_v28 = vsub.f32 %v1429_v25, %v1432_v26 }
 0xa19   :  { %v1437_v29 = vadd.f32 1e-05, %v1434_v28 }
 0xa1b   :  { %2426 = vrsqrt.f32 %v1437_v29 }
 0xa25   :  { %v2427_v31 = vpop.eup %2426 }
 0xa26   :  { %v1446_v43 = vrot.slane %v2427_v31, %v2818_v2 }
 0xa28   :  { %v1447_v50 = vcombine.high %v1446_v43, %v1446_v43 }
 0xa2a   :  { %v1454_v33 = vrot.slane %v1447_v50, %v2818_v2 }
 0xa2c   :  { %v1456_v34 = vmul.f32 %v2013_v32, %v1454_v33  ;;  %v2436_v32 = vld [vmem:[#allocation8 + $0x10] sm:$0xff] }
 0xa2e   :  { %v1459_v35 = vmul.f32 %v1456_v34, %v1429_v25  ;;  %v1465_v37 = vrot.slane %v1456_v34, %v2825_v7  ;;  %v2437_v34 = vld [vmem:[#allocation8 + $0x18] sm:$0xff] }
 0xa30   :  { %v1460_v41 = vsub.f32 %v2014_v30, %v1459_v35  ;;  %v1469_v45 = vmul.f32 %v1465_v37, %v2958_v16  ;;  %v1470_v46 = vmul.f32 %v1465_v37, %v2963_v21  ;;  %v1467_v53 = vmul.f32 %v1465_v37, %v2948_v1 }
 0xa31   :  { %v1468_v47 = vmul.f32 %v1465_v37, %v2950_v6 }
 0xa32   :  { %v1475_v48 = vrot.slane %v1460_v41, %v2825_v7 }
 0xa34   :  { %v1479_v49 = vadd.f32 %v1475_v48, %v1469_v45  ;;  %v1480_v55 = vadd.f32 %v1475_v48, %v1470_v46  ;;  %v1477_v56 = vadd.f32 %v1475_v48, %v1467_v53  ;;  %v1478_v52 = vadd.f32 %v1475_v48, %v1468_v47 }
 0xa36   :  { %v1484_v54 = vmax.f32 %v1480_v55, 0.0  ;;  %v1481_v51 = vmax.f32 %v1477_v56, 0.0  ;;  %v1482_v59 = vmax.f32 %v1478_v52, 0.0  ;;  %v1483_v57 = vmax.f32 %v1479_v49, 0.0 }
 0xa38   :  { %v1488_v58 = vadd.f32 %v1484_v54, %v2906_v20  ;;  %v1485_v16 = vadd.f32 %v1481_v51, %v2908_v22  ;;  %v1486_v21 = vadd.f32 %v1482_v59, %v2910_v23  ;;  %v1487_v60 = vadd.f32 %v1483_v57, %v2904_v19 }
 0xa3a   :  { %v1489_v61 = vrot.slane %v1485_v16, 7  ;;  %v1490_v1 = vrot.slane %v1486_v21, 7  ;;  %v1514_v62 = vpack.c.bf16 %v1486_v21, %v1485_v16  ;;  %v1492_v6 = vrot.slane %v1488_v58, 7 }
 0xa3b   :  { %v1501_v63 = vrot.slane %v1485_v16, 1  ;;  %v1502_v0 = vrot.slane %v1486_v21, 1  ;;  %v1503_v3 = vrot.slane %v1487_v60, 1  ;;  %v1504_v5 = vrot.slane %v1488_v58, 1 }
 0xa3c   :  { %1744 = vmatprep.mubr.bf16.mxu1 %v1514_v62  ;;  %v1495_v4 = vsel %vm249_vm0, %v1489_v61, %v1490_v1  ;;  %v1496_v20 = vsel %vm249_vm0, %v1492_v6, %v1489_v61  ;;  %v1491_v22 = vrot.slane %v1487_v60, 7  ;;  %v1517_v29 = vpack.c.bf16 %v1488_v58, %v1487_v60 }
 0xa3d   :  { %v1497_v23 = vmul.f32 %v2430_v8, %v1496_v20  ;;  %v1498_v19 = vmul.f32 %v2431_v12, %v1495_v4  ;;  %v1506_v13 = vsel %vm262_vm1, %v1502_v0, %v1503_v3  ;;  %v1507_v9 = vsel %vm262_vm1, %v1501_v63, %v1502_v0 }
 0xa3e   :  { %v1509_v11 = vmul.f32 %v2432_v10, %v1507_v9  ;;  %v1510_v15 = vmul.f32 %v2433_v14, %v1506_v13  ;;  %v1505_v17 = vsel %vm262_vm1, %v1503_v3, %v1504_v5  ;;  %v1508_v18 = vsel %vm262_vm1, %v1504_v5, %v1501_v63 }
 0xa3f   :  { %v1513_v27 = vpack.c.bf16 %v1498_v19, %v1497_v23  ;;  %v1511_v25 = vmul.f32 %v2434_v39, %v1505_v17  ;;  %v1512_v26 = vmul.f32 %v2435_v24, %v1508_v18  ;;  %v1493_v31 = vsel %vm249_vm0, %v1491_v22, %v1492_v6 }
 0xa40   :  { %v1515_v28 = vpack.c.bf16 %v1510_v15, %v1509_v11  ;;  %v1494_v43 = vsel %vm249_vm0, %v1490_v1, %v1491_v22  ;;  %v1500_v30 = vmul.f32 %v2437_v34, %v1493_v31 }
 0xa41   :  { %1745 = vmatmul.mubr.bf16.vlgmr.msra.gmra.mrb[24].mxu1 %v1513_v27  ;;  %v1518_v50 = vpack.c.bf16 %v1512_v26, %v1511_v25  ;;  %v1499_v33 = vmul.f32 %v2436_v32, %v1494_v43 }
 0xa42   :  { %2299 = vmatprep.mubr.bf16.mxu0 %v1515_v28  ;;  %1752 = vmatprep.mubr.bf16.mxu1 %v1517_v29 }
 0xa43   :  { %2300 = vmatmul.mubr.bf16.vlgmr.msra.gmra.mrb[16].mxu0 %v1518_v50  ;;  %v1516_v35 = vpack.c.bf16 %v1500_v30, %v1499_v33 }
 0xa49   :  { %1753 = vmatmul.mubr.bf16.gmra.mrb[28].mxu1 %v1516_v35 }
 0xb14   :  { %v2181_v37 = vpop.f32.mrb[24].mxu1 }
 0xb15   :  { %v2182_v41 = vpop.f32.mrb[25].mxu1 }
 0xb16   :  { %v2183_v45 = vadd.f32 %v2182_v41, %v2181_v37  ;;  %v2301_v46 = vpop.f32.mrb[16].mxu0  ;;  %v2184_v48 = vpop.f32.mrb[26].mxu1  ;;  %v2039_v41 = vld [vmem:[%s3051_s4 + $0x3] sm:$0x1]  ;;  %s2590_s4 = smov [#allocation11]  }
 0xb17   :  { %v1795_v53 = vpop.f32.mrb[17].mxu0  ;;  %v2185_v47 = vpop.f32.mrb[27].mxu1  ;;  %s1914_s23 = sshll.u32 %s2590_s4, 4  ;;  %s1915_s23 = int_to_ptr.vmem [resolvable:$true] %s1914_s23 }
 0xb18   :  { %v3007_v36 = vadd.f32 %v2183_v45, %v1795_v53  ;;  %v2186_v49 = vadd.f32 %v2185_v47, %v2184_v48  ;;  %v2302_v55 = vpop.f32.mrb[18].mxu0  ;;  %v2040_v48 = vld [vmem:[%s3052_s5 + $0x3] sm:$0x1]  ;;  %s2548_s5 = scalar_lea.vmem %s1915_s23, 512  ;;  %p2553_p13 = scmp.lt.s32.totalorder %s1915_s23, %s1915_s23 }
 0xb19   :  { %v1798_v56 = vpop.f32.mrb[19].mxu0  ;;  %p2549_p12 = scmp.ne.s32.totalorder %s1915_s23, %s2548_s5  ;;  %p2554_p0 = scmp.lt.s32.totalorder %s2548_s5, %s2548_s5 }
 0xb1a   :  { %v1799_v52 = vadd.f32 %v2186_v49, %v1798_v56  ;;  %v1819_v21 = vmul.f32 %v3007_v36, %v3007_v36 }
 0xb1b   :  { %p2555_p1 = por %p2554_p0, %p2553_p13 }
 0xb1c   :  { %v2187_v54 = vpop.f32.mrb[28].mxu1  ;;  %v1820_v59 = vmul.f32 %v1799_v52, %v1799_v52  ;;  %v1810_v60 = vadd.f32 %v1799_v52, %v3007_v36 }
 0xb1d   :  { %v2188_v51 = vpop.f32.mrb[29].mxu1  ;;  %p2556_p2 = pnand %p2555_p1, %p2549_p12 }
 0xb1e   :  { %v2189_v57 = vadd.f32 %v2188_v51, %v2187_v54  ;;  %v2190_v58 = vpop.f32.mrb[30].mxu1  ;;  %v1823_v62 = vadd.f32 %v1820_v59, %v1819_v21 }
 0xb1f   :  { %v2191_v16 = vpop.f32.mrb[31].mxu1 }
 0xb20   :  { %v1804_v61 = vadd.f32 %v2301_v46, %v2189_v57  ;;  %v2192_v1 = vadd.f32 %v2191_v16, %v2190_v58 }
 0xb22   :  { %v1811_v6 = vadd.f32 %v1810_v60, %v1804_v61  ;;  %v1821_v63 = vmul.f32 %v1804_v61, %v1804_v61  ;;  %v1807_v0 = vadd.f32 %v2302_v55, %v2192_v1 }
 0xb24   :  { %v1824_v3 = vadd.f32 %v1823_v62, %v1821_v63  ;;  %v1812_v4 = vadd.f32 %v1811_v6, %v1807_v0  ;;  %v1822_v20 = vmul.f32 %v1807_v0, %v1807_v0 }
 0xb26   :  { %v1813_v5 = vrot.slane %v1812_v4, 4  ;;  %v1825_v22 = vadd.f32 %v1824_v3, %v1822_v20 }
 0xb28   :  { %v1814_v8 = vadd.f32 %v1813_v5, %v1812_v4  ;;  %v1826_v23 = vrot.slane %v1825_v22, 4 }
 0xb2a   :  { %v1815_v12 = vrot.slane %v1814_v8, 2  ;;  %v1827_v19 = vadd.f32 %v1826_v23, %v1825_v22 }
 0xb2c   :  { %v1816_v13 = vadd.f32 %v1815_v12, %v1814_v8  ;;  %v1828_v9 = vrot.slane %v1827_v19, 2 }
 0xb2e   :  { %v1817_v10 = vrot.slane %v1816_v13, 1  ;;  %v1829_v11 = vadd.f32 %v1828_v9, %v1827_v19 }
 0xb30   :  { %v1830_v14 = vrot.slane %v1829_v11, 1  ;;  %v1818_v15 = vadd.f32 %v1817_v10, %v1816_v13 }
 0xb32   :  { %v1831_v17 = vadd.f32 %v1830_v14, %v1829_v11 }
 0xb34   :  { %v1832_v18 = vsel %vm589_vm2, %v1818_v15, %v1831_v17 }
 0xb35   :  { %1833 = vrot.lane.b32.xlu0 %v1832_v18, %s2583_s28 }
 0xba7   :  { %v1834_v27 = vpop.permute.xlu0 %1833 }
 0xba8   :  { %v1835_v39 = vadd.f32 %v1834_v27, %v1832_v18 }
 0xbaa   :  { %1836 = vrot.lane.b32.xlu1 %v1835_v39, %s2587_s2 }
 0xc1c   :  { %v1837_v25 = vpop.permute.xlu1 %1836 }
 0xc1d   :  { %v1838_v24 = vadd.f32 %v1837_v25, %v1835_v39 }
 0xc1f   :  { %1839 = vrot.lane.b32.xlu0 %v1838_v24, %s2588_s25 }
 0xc91   :  { %v1840_v26 = vpop.permute.xlu0 %1839 }
 0xc92   :  { %v1841_v28 = vadd.f32 %v1840_v26, %v1838_v24 }
 0xc94   :  { %1842 = vrot.lane.b32.xlu1 %v1841_v28, %s2580_s17 }
 0xd06   :  { %v1843_v29 = vpop.permute.xlu1 %1842 }
 0xd07   :  { %v1844_v31 = vadd.f32 %v1843_v29, %v1841_v28 }
 0xd09   :  { %v1845_v43 = vmul.f32 0.001953125, %v1844_v31 }
 0xd0b   :  { %v1846_v50 = vmul.f32 %v1845_v43, %v1845_v43 }
 0xd0d   :  { %v1848_v32 = vrot.slane %v1846_v50, 7 }
 0xd0f   :  { %v1850_v33 = vsub.f32 %v1845_v43, %v1848_v32 }
 0xd11   :  { %v1853_v34 = vadd.f32 1e-05, %v1850_v33 }
 0xd13   :  { %2428 = vrsqrt.f32 %v1853_v34 }
 0xd1d   :  { %v2429_v30 = vpop.eup %2428 }
 0xd1e   :  { %v1862_v35 = vrot.slane %v2429_v30, %v2818_v2 }
 0xd20   :  { %v1863_v37 = vcombine.high %v1862_v35, %v1862_v35 }
 0xd22   :  { %v1870_v45 = vrot.slane %v1863_v37, %v2818_v2 }
 0xd24   :  { %v1872_v46 = vmul.f32 %v2039_v41, %v1870_v45 }
 0xd26   :  { %v1875_v53 = vmul.f32 %v1872_v46, %v1845_v43  ;;  %v1881_v47 = vrot.slane %v1872_v46, %v2825_v7 }
 0xd28   :  { %v1876_v49 = vsub.f32 %v2040_v48, %v1875_v53  ;;  %v1883_v55 = vmul.f32 %v1881_v47, %v3007_v36  ;;  %v1884_v54 = vmul.f32 %v1881_v47, %v1799_v52  ;;  %v1885_v51 = vmul.f32 %v1881_v47, %v1804_v61 }
 0xd29   :  { %v1886_v59 = vmul.f32 %v1881_v47, %v1807_v0 }
 0xd2a   :  { %v1891_v56 = vrot.slane %v1876_v49, %v2825_v7 }
 0xd2c   :  { %v1893_v57 = vadd.f32 %v1891_v56, %v1883_v55  ;;  %v1894_v58 = vadd.f32 %v1891_v56, %v1884_v54  ;;  %v1895_v16 = vadd.f32 %v1891_v56, %v1885_v51  ;;  %v1896_v2 = vadd.f32 %v1891_v56, %v1886_v59 }
 0xd2e   :  { %v1897_v21 = vmax.f32 %v1893_v57, 0.0  ;;  %v1898_v60 = vmax.f32 %v1894_v58, 0.0  ;;  %v1899_v1 = vmax.f32 %v1895_v16, 0.0  ;;  %v1900_v62 = vmax.f32 %v1896_v2, 0.0 }
 0xd30   :  { %v1901_v6 = vadd.f32 %v1897_v21, %v2732_v40  ;;  %v1902_v63 = vadd.f32 %v1898_v60, %v2737_v44  ;;  %v1903_v36 = vadd.f32 %v1899_v1, %v2730_v38  ;;  %v1904_v7 = vadd.f32 %v1900_v62, %v2734_v42 }
 0xd32   :  { %1905 = vst [vmem:[#allocation11] sm:$0xff] %v1901_v6  ;;  %1906 = vst [vmem:[#allocation11 + $0x8] sm:$0xff] %v1902_v63 }
 0xd33   :  { %1907 = vst [vmem:[#allocation11 + $0x10] sm:$0xff] %v1903_v36  ;;  %1908 = vst [vmem:[#allocation11 + $0x18] sm:$0xff] %v1904_v7 }
 0xd34   :  { %2559 = shalt.err (!%p2556_p2)
}
 0xd35   :  { %s2560_s24 = scalar_lea.hbm %s3055_s8, 512 }
 0xd36   :  { %p2561_p3 = scmp.ne.s32.totalorder %s3055_s8, %s2560_s24  ;;  %p2564_p4 = scmp.lt.u32.totalorder %s2560_s24, %s3055_s8 }
 0xd38   :  { %p2566_p5 = pnand %p2564_p4, %p2561_p3 }
 0xd3a   :  { %2569 = shalt.err (!%p2566_p5)
}
 0xd3b   :  { %1920 = dma.vmem_to_hbm [thread:$0]  %s1915_s23, 512, %s3055_s8, [#allocation4], %s2582_s1, %s2582_s1, %s2583_s28  }
 0xd3c   :  { %2576 = dma.done.wait [#allocation4], 512  }
 0xd3d   :  { %2577 = vsyncadd [#allocation4], 4294966784 }
 0xd3e   :  { %1924 = vsyncpa [#allocation3], 1 }
 0xd3f   :  { %1925 = vsyncpa [#allocation6], 1 }
 0xd40   :  { %1926 = vsyncpa [#allocation9], 1 }
 0xd41   :  { %1927 = vsyncpa [#allocation4], 1 }

</bundles_post_ra>
